<compile_context>
chip_gen: v6e
topology: v6e:2x2x1
jax: 0.10.0
libtpu: 0.0.40
codegen_flags: <defaults>
</compile_context>

<pallas_src>
import jax
import jax.numpy as jnp
from jax.experimental import pallas as pl
from jax.experimental.pallas import tpu as pltpu


def _relu_matmul_kernel(x_ref, w_ref, o_ref):
    # x_ref: (1, C_in, HW_blk) f32   w_ref: (C_out, C_in) bf16
    # o_ref: (1, C_out, HW_blk) f32
    # Cast first, then ReLU in bf16 (halves VALU element count on bf16-capable
    # VPUs; exactly equivalent to ReLU-then-cast for max(x, 0)).
    x = jnp.maximum(x_ref[0].astype(jnp.bfloat16), 0.0)
    o_ref[0] = jnp.dot(
        w_ref[...], x, preferred_element_type=jnp.float32   # bf16 MXU, f32 accum
    ).astype(o_ref.dtype)


def _num_tensorcores_per_device() -> int:
    """2 for chips whose JAX device spans two TensorCores (v4/v5p megacore,
    v7x); 1 for v5e / v6e.  A wrong guess only costs a little perf, never
    correctness."""
    try:
        kind = jax.devices()[0].device_kind.lower()
    except Exception:
        return 1
    if "lite" in kind:                      # "TPU v5 lite" (v5e), "TPU v6 lite" (v6e)
        return 1
    if any(tag in kind for tag in ("v7", "v5p", "v4")):
        return 2
    return 1


def prepare_weight(weight_oihw: jax.Array) -> jax.Array:
    """Hoisted weight prep (once per parameter, not per call):
    (C_out, C_in, 1, 1) f32 -> (C_out, C_in) bf16 (no transpose needed)."""
    c_out, c_in = weight_oihw.shape[0], weight_oihw.shape[1]
    return weight_oihw.reshape(c_out, c_in).astype(jnp.bfloat16)


def relu_conv2d_1x1(x_nchw: jax.Array, w_mat: jax.Array) -> jax.Array:
    """ReLU followed by a 1x1 conv (no bias), matching PyTorch semantics.

    x_nchw: [N, C_in, H, W] float32
    w_mat:  [C_out, C_in]   bfloat16 (from prepare_weight)
    returns [N, C_out, H, W] float32
    """
    n, c_in, h, w = x_nchw.shape
    c_out = w_mat.shape[0]
    hw = h * w

    # Free reshape: NCHW -> [N, C_in, H*W].
    x3 = x_nchw.reshape(n, c_in, hw)

    # Megacore split along HW (matmul N dim) only when there are 2 TensorCores
    # to feed; single-TC chips keep whole-problem blocks (one step per batch row).
    hw_blk = 128 if (_num_tensorcores_per_device() >= 2 and hw > 128) else hw
    n_hw = pl.cdiv(hw, hw_blk)

    out = pl.pallas_call(
        _relu_matmul_kernel,
        out_shape=jax.ShapeDtypeStruct((n, c_out, hw), jnp.float32),
        grid_spec=pltpu.PrefetchScalarGridSpec(
            num_scalar_prefetch=0,
            grid=(n, n_hw),
            in_specs=[
                # Activation: one batch row, one HW block per grid step.
                pl.BlockSpec((1, c_in, hw_blk), lambda b, j: (b, 0, j)),
                # Full weight, constant index map -> fetched once, VMEM-resident.
                pl.BlockSpec((c_out, c_in), lambda b, j: (0, 0)),
            ],
            out_specs=pl.BlockSpec((1, c_out, hw_blk), lambda b, j: (b, 0, j)),
        ),
        compiler_params=pltpu.CompilerParams(
            dimension_semantics=("parallel", "parallel"),
        ),
        cost_estimate=pl.CostEstimate(
            flops=2 * n * hw * c_in * c_out,
            transcendentals=0,
            bytes_accessed=(x3.size * 4 + w_mat.size * 2 + n * c_out * hw * 4),
        ),
    )(x3, w_mat)

    # Free reshape back: [N, C_out, H*W] -> NCHW.
    return out.reshape(n, c_out, h, w)


if __name__ == "__main__":
    key = jax.random.PRNGKey(0)
    k_x, k_w = jax.random.split(key)

    # Shapes implied by the module: Conv2d(1152, 192, 1x1), input 1x1152x14x14.
    x = jax.random.normal(k_x, (1, 1152, 14, 14), dtype=jnp.float32)
    weight = jax.random.normal(k_w, (192, 1152, 1, 1), dtype=jnp.float32) * 0.02

    w_mat = prepare_weight(weight)          # hoisted: reshape + bf16 cast done once
    out = relu_conv2d_1x1(x, w_mat)
    jax.block_until_ready(out)

    # Sanity check against a pure-JAX f32 reference (bf16 operands -> looser tol).
    ref = jax.lax.conv_general_dilated(
        jnp.maximum(x, 0.0),
        weight,
        window_strides=(1, 1),
        padding="VALID",
        dimension_numbers=("NCHW", "OIHW", "NCHW"),
    )
    assert out.shape == (1, 192, 14, 14)
    assert jnp.allclose(out, ref, atol=2e-2, rtol=2e-2)

    print("KERNEL_OK")
</pallas_src>

<mosaic_0001>
module attributes {stable_mosaic.version = 11 : i64} {
  func.func @_relu_matmul_kernel(%arg0: i32, %arg1: i32, %arg2: memref<1x1152x196xf32, #tpu.memory_space<vmem>>, %arg3: memref<192x1152xbf16, #tpu.memory_space<vmem>>, %arg4: memref<1x192x196xf32, #tpu.memory_space<vmem>>) attributes {dimension_semantics = [#tpu.dimension_semantics<parallel>, #tpu.dimension_semantics<parallel>], iteration_bounds = array<i64: 1, 1>, scalar_prefetch = 0 : i64, scratch_operands = 0 : i64, tpu.core_type = #tpu.core_type<tc>, window_params = [{transform_indices = @transform_0, window_bounds = array<i64: 1, 1152, 196>}, {pipeline_mode = #tpu.pipeline_mode<synchronous>, transform_indices = @transform_1, window_bounds = array<i64: 192, 1152>}, {transform_indices = @transform_2, window_bounds = array<i64: 1, 192, 196>}]} {
    %c0 = arith.constant 0 : index
    %c0_0 = arith.constant 0 : index
    %c0_1 = arith.constant 0 : index
    %0 = vector.load %arg2[%c0, %c0_0, %c0_1] : memref<1x1152x196xf32, #tpu.memory_space<vmem>>, vector<1x1152x196xf32>
    %1 = vector.shape_cast %0 : vector<1x1152x196xf32> to vector<1152x196xf32>
    %2 = arith.truncf %1 : vector<1152x196xf32> to vector<1152x196xbf16>
    %cst = arith.constant 0.000000e+00 : bf16
    %3 = vector.broadcast %cst : bf16 to vector<1152x196xbf16>
    %4 = arith.maximumf %2, %3 : vector<1152x196xbf16>
    %c0_2 = arith.constant 0 : index
    %c0_3 = arith.constant 0 : index
    %5 = vector.load %arg3[%c0_2, %c0_3] : memref<192x1152xbf16, #tpu.memory_space<vmem>>, vector<192x1152xbf16>
    %cst_4 = arith.constant dense<0.000000e+00> : vector<192x196xf32>
    %6 = tpu.matmul %5, %4, %cst_4 {dimension_numbers = #tpu.dot_dimension_numbers<[1], [0], [0], [1], [0, 0, 1, 1], [], []>} : vector<192x1152xbf16>, vector<1152x196xbf16>, vector<192x196xf32> -> vector<192x196xf32>
    %c0_5 = arith.constant 0 : index
    %c0_6 = arith.constant 0 : index
    %c0_7 = arith.constant 0 : index
    %7 = vector.load %arg4[%c0_5, %c0_6, %c0_7] : memref<1x192x196xf32, #tpu.memory_space<vmem>>, vector<1x192x196xf32>
    %8 = vector.shape_cast %7 : vector<1x192x196xf32> to vector<192x196xf32>
    %9 = vector.shape_cast %6 : vector<192x196xf32> to vector<1x192x196xf32>
    tpu.vector_store %arg4[%c0_5, %c0_6, %c0_7], %9 {strides = array<i32>} : memref<1x192x196xf32, #tpu.memory_space<vmem>>, vector<1x192x196xf32>,
    return
  }
  func.func @transform_0(%arg0: i32, %arg1: i32) -> (i32, i32, i32) {
    %c0_i32 = arith.constant 0 : i32
    %c0_i32_0 = arith.constant 0 : i32
    return %arg0, %c0_i32, %arg1 : i32, i32, i32
  }
  func.func @transform_1(%arg0: i32, %arg1: i32) -> (i32, i32) {
    %c0_i32 = arith.constant 0 : i32
    %c0_i32_0 = arith.constant 0 : i32
    %c0_i32_1 = arith.constant 0 : i32
    return %c0_i32, %c0_i32_0 : i32, i32
  }
  func.func @transform_2(%arg0: i32, %arg1: i32) -> (i32, i32, i32) {
    %c0_i32 = arith.constant 0 : i32
    %c0_i32_0 = arith.constant 0 : i32
    return %arg0, %c0_i32, %arg1 : i32, i32, i32
  }
}

</mosaic_0001>

<bundles_post_ra>
// kernel: tpu_custom_call.1
= control target key start
LH: loop header
LB: loop body
LE: loop exit
PB: predicated region body
PF: predicated region fallthrough
CT: control target
= control target key end

     0   :  { %v2397_v12 = vmov 0   ;;  %s4120_s0 = inlined_call_operand.vmem [shape: f32[1,1152,196], index: 0, kind: input, shape index: {}]   ;;  %s4121_s1 = inlined_call_operand.vmem [shape: bf16[192,1152], index: 1, kind: input, shape index: {}]   ;;  %s4122_s2 = inlined_call_operand.hbm [shape: f32[1,192,196], index: 2, kind: output, shape index: {}]  }
   0x1   :  { %v42_v0 = vld [vmem:[%s4120_s0 + $0xe8] sm:$0xff]  ;;  %v44_v1 = vld [vmem:[%s4120_s0 + $0xf8] sm:$0xff]  ;;  %v41_v5 = vld [vmem:[%s4120_s0 + $0xe0] sm:$0xff] }
   0x2   :  { %v106_v2 = vld [vmem:[%s4120_s0 + $0x2e8] sm:$0xff]  ;;  %v316_v3 = vpack.c.bf16 %v44_v1, %v42_v0  ;;  %v108_v4 = vld [vmem:[%s4120_s0 + $0x2f8] sm:$0xff]  ;;  %v43_v6 = vld [vmem:[%s4120_s0 + $0xf0] sm:$0xff] }
   0x3   :  { %v348_v7 = vpack.c.bf16 %v108_v4, %v106_v2  ;;  %v315_v8 = vpack.c.bf16 %v43_v6, %v41_v5  ;;  %v105_v9 = vld [vmem:[%s4120_s0 + $0x2e0] sm:$0xff]  ;;  %v107_v10 = vld [vmem:[%s4120_s0 + $0x2f0] sm:$0xff]  ;;  %v38_v11 = vld [vmem:[%s4120_s0 + $0xc8] sm:$0xff] }
   0x4   :  { %v460_v13 = vmax.bf16 %v2397_v12, %v316_v3  ;;  %v347_v14 = vpack.c.bf16 %v107_v10, %v105_v9  ;;  %v40_v15 = vld [vmem:[%s4120_s0 + $0xd8] sm:$0xff]  ;;  %v102_v16 = vld [vmem:[%s4120_s0 + $0x2c8] sm:$0xff]  ;;  %v37_v22 = vld [vmem:[%s4120_s0 + $0xc0] sm:$0xff] }
   0x5   :  { %v104_v17 = vld [vmem:[%s4120_s0 + $0x2d8] sm:$0xff]  ;;  %v492_v18 = vmax.bf16 %v2397_v12, %v348_v7  ;;  %v459_v19 = vmax.bf16 %v2397_v12, %v315_v8  ;;  %v314_v20 = vpack.c.bf16 %v40_v15, %v38_v11  ;;  %v39_v23 = vld [vmem:[%s4120_s0 + $0xd0] sm:$0xff]  ;;  %v101_v24 = vld [vmem:[%s4120_s0 + $0x2c0] sm:$0xff] }
   0x6   :  { %v346_v21 = vpack.c.bf16 %v104_v17, %v102_v16  ;;  %1261 = vmatprep.subr.bf16.mxu0 %v460_v13  ;;  %v491_v25 = vmax.bf16 %v2397_v12, %v347_v14  ;;  %v313_v26 = vpack.c.bf16 %v39_v23, %v37_v22  ;;  %v103_v27 = vld [vmem:[%s4120_s0 + $0x2d0] sm:$0xff]  ;;  %v34_v28 = vld [vmem:[%s4120_s0 + $0xa8] sm:$0xff]  ;;  %v36_v29 = vld [vmem:[%s4120_s0 + $0xb8] sm:$0xff] }
   0x7   :  { %1414 = vmatprep.subr.bf16.mxu1 %v492_v18  ;;  %1262 = vmatpush1.bf16.msra.mxu0 %v459_v19  ;;  %v458_v30 = vmax.bf16 %v2397_v12, %v314_v20  ;;  %v345_v32 = vpack.c.bf16 %v103_v27, %v101_v24  ;;  %v98_v33 = vld [vmem:[%s4120_s0 + $0x2a8] sm:$0xff]  ;;  %v100_v34 = vld [vmem:[%s4120_s0 + $0x2b8] sm:$0xff]  ;;  %v33_v35 = vld [vmem:[%s4120_s0 + $0xa0] sm:$0xff]  ;;  %v312_v37 = vpack.c.bf16 %v36_v29, %v34_v28 }
   0x8   :  { %v490_v31 = vmax.bf16 %v2397_v12, %v346_v21  ;;  %1415 = vmatpush1.bf16.msra.mxu1 %v491_v25  ;;  %v457_v36 = vmax.bf16 %v2397_v12, %v313_v26  ;;  %v344_v38 = vpack.c.bf16 %v100_v34, %v98_v33  ;;  %v35_v39 = vld [vmem:[%s4120_s0 + $0xb0] sm:$0xff]  ;;  %v97_v40 = vld [vmem:[%s4120_s0 + $0x2a0] sm:$0xff]  ;;  %v30_v45 = vld [vmem:[%s4120_s0 + $0x88] sm:$0xff] }
   0x9   :  { %v99_v41 = vld [vmem:[%s4120_s0 + $0x2b0] sm:$0xff]  ;;  %1263 = vmatprep.subr.bf16.mxu0 %v458_v30  ;;  %v489_v42 = vmax.bf16 %v2397_v12, %v345_v32  ;;  %v311_v43 = vpack.c.bf16 %v35_v39, %v33_v35  ;;  %v32_v46 = vld [vmem:[%s4120_s0 + $0x98] sm:$0xff]  ;;  %v94_v47 = vld [vmem:[%s4120_s0 + $0x288] sm:$0xff]  ;;  %v456_v48 = vmax.bf16 %v2397_v12, %v312_v37 }
   0xa   :  { %1416 = vmatprep.subr.bf16.mxu1 %v490_v31  ;;  %v343_v44 = vpack.c.bf16 %v99_v41, %v97_v40  ;;  %v488_v49 = vmax.bf16 %v2397_v12, %v344_v38  ;;  %v310_v50 = vpack.c.bf16 %v32_v46, %v30_v45  ;;  %v96_v51 = vld [vmem:[%s4120_s0 + $0x298] sm:$0xff]  ;;  %v29_v52 = vld [vmem:[%s4120_s0 + $0x80] sm:$0xff]  ;;  %v31_v53 = vld [vmem:[%s4120_s0 + $0x90] sm:$0xff] }
   0xb   :  { %1264 = vmatpush1.bf16.msra.mxu0 %v457_v36  ;;  %v455_v54 = vmax.bf16 %v2397_v12, %v311_v43  ;;  %v342_v55 = vpack.c.bf16 %v96_v51, %v94_v47  ;;  %v309_v56 = vpack.c.bf16 %v31_v53, %v29_v52  ;;  %v93_v57 = vld [vmem:[%s4120_s0 + $0x280] sm:$0xff]  ;;  %v95_v58 = vld [vmem:[%s4120_s0 + $0x290] sm:$0xff]  ;;  %v26_v59 = vld [vmem:[%s4120_s0 + $0x68] sm:$0xff] }
   0xc   :  { %1417 = vmatpush1.bf16.msra.mxu1 %v489_v42  ;;  %1265 = vmatprep.subr.bf16.mxu0 %v456_v48  ;;  %v487_v60 = vmax.bf16 %v2397_v12, %v343_v44  ;;  %v454_v61 = vmax.bf16 %v2397_v12, %v310_v50  ;;  %v341_v62 = vpack.c.bf16 %v95_v58, %v93_v57  ;;  %v28_v63 = vld [vmem:[%s4120_s0 + $0x78] sm:$0xff]  ;;  %v90_v0 = vld [vmem:[%s4120_s0 + $0x268] sm:$0xff]  ;;  %v25_v5 = vld [vmem:[%s4120_s0 + $0x60] sm:$0xff] }
   0xd   :  { %v92_v1 = vld [vmem:[%s4120_s0 + $0x278] sm:$0xff]  ;;  %1418 = vmatprep.subr.bf16.mxu1 %v488_v49  ;;  %v486_v2 = vmax.bf16 %v2397_v12, %v342_v55  ;;  %v308_v3 = vpack.c.bf16 %v28_v63, %v26_v59  ;;  %v27_v6 = vld [vmem:[%s4120_s0 + $0x70] sm:$0xff]  ;;  %v89_v7 = vld [vmem:[%s4120_s0 + $0x260] sm:$0xff]  ;;  %v453_v11 = vmax.bf16 %v2397_v12, %v309_v56 }
   0xe   :  { %v340_v4 = vpack.c.bf16 %v92_v1, %v90_v0  ;;  %v91_v8 = vld [vmem:[%s4120_s0 + $0x270] sm:$0xff]  ;;  %v22_v9 = vld [vmem:[%s4120_s0 + $0x48] sm:$0xff]  ;;  %v24_v10 = vld [vmem:[%s4120_s0 + $0x58] sm:$0xff]  ;;  %v307_v13 = vpack.c.bf16 %v27_v6, %v25_v5  ;;  %v485_v17 = vmax.bf16 %v2397_v12, %v341_v62 }
   0xf   :  { %1266 = vmatpush1.bf16.msra.mxu0 %v455_v54  ;;  %v339_v14 = vpack.c.bf16 %v91_v8, %v89_v7  ;;  %v86_v15 = vld [vmem:[%s4120_s0 + $0x248] sm:$0xff]  ;;  %v88_v16 = vld [vmem:[%s4120_s0 + $0x258] sm:$0xff]  ;;  %v452_v18 = vmax.bf16 %v2397_v12, %v308_v3  ;;  %v306_v19 = vpack.c.bf16 %v24_v10, %v22_v9  ;;  %v21_v20 = vld [vmem:[%s4120_s0 + $0x40] sm:$0xff] }
  0x10   :  { %1419 = vmatpush1.bf16.msra.mxu1 %v487_v60  ;;  %1267 = vmatprep.subr.bf16.mxu0 %v454_v61  ;;  %v23_v21 = vld [vmem:[%s4120_s0 + $0x50] sm:$0xff]  ;;  %v85_v22 = vld [vmem:[%s4120_s0 + $0x240] sm:$0xff]  ;;  %v484_v23 = vmax.bf16 %v2397_v12, %v340_v4  ;;  %v338_v24 = vpack.c.bf16 %v88_v16, %v86_v15  ;;  %v18_v26 = vld [vmem:[%s4120_s0 + $0x28] sm:$0xff]  ;;  %v451_v30 = vmax.bf16 %v2397_v12, %v307_v13 }
  0x11   :  { %1420 = vmatprep.subr.bf16.mxu1 %v486_v2  ;;  %v87_v25 = vld [vmem:[%s4120_s0 + $0x250] sm:$0xff]  ;;  %v20_v27 = vld [vmem:[%s4120_s0 + $0x38] sm:$0xff]  ;;  %v82_v28 = vld [vmem:[%s4120_s0 + $0x228] sm:$0xff]  ;;  %v483_v31 = vmax.bf16 %v2397_v12, %v339_v14  ;;  %v305_v32 = vpack.c.bf16 %v23_v21, %v21_v20  ;;  %v450_v34 = vmax.bf16 %v2397_v12, %v306_v19 }
  0x12   :  { %v84_v29 = vld [vmem:[%s4120_s0 + $0x238] sm:$0xff]  ;;  %v17_v33 = vld [vmem:[%s4120_s0 + $0x20] sm:$0xff]  ;;  %v337_v35 = vpack.c.bf16 %v87_v25, %v85_v22  ;;  %v304_v36 = vpack.c.bf16 %v20_v27, %v18_v26  ;;  %v19_v37 = vld [vmem:[%s4120_s0 + $0x30] sm:$0xff]  ;;  %v482_v40 = vmax.bf16 %v2397_v12, %v338_v24 }
  0x13   :  { %1268 = vmatpush1.bf16.msra.mxu0 %v453_v11  ;;  %v81_v38 = vld [vmem:[%s4120_s0 + $0x220] sm:$0xff]  ;;  %v83_v39 = vld [vmem:[%s4120_s0 + $0x230] sm:$0xff]  ;;  %v336_v41 = vpack.c.bf16 %v84_v29, %v82_v28  ;;  %v14_v42 = vld [vmem:[%s4120_s0 + $0x8] sm:$0xff]  ;;  %v449_v46 = vmax.bf16 %v2397_v12, %v305_v32  ;;  %v303_v47 = vpack.c.bf16 %v19_v37, %v17_v33 }
  0x14   :  { %1421 = vmatpush1.bf16.msra.mxu1 %v485_v17  ;;  %1269 = vmatprep.subr.bf16.mxu0 %v452_v18  ;;  %v16_v43 = vld [vmem:[%s4120_s0 + $0x18] sm:$0xff]  ;;  %v78_v44 = vld [vmem:[%s4120_s0 + $0x208] sm:$0xff]  ;;  %v335_v48 = vpack.c.bf16 %v83_v39, %v81_v38  ;;  %v481_v49 = vmax.bf16 %v2397_v12, %v337_v35  ;;  %v448_v50 = vmax.bf16 %v2397_v12, %v304_v36  ;;  %v13_v52 = vld [vmem:[%s4120_s0] sm:$0xff] }
  0x15   :  { %1422 = vmatprep.subr.bf16.mxu1 %v484_v23  ;;  %v80_v45 = vld [vmem:[%s4120_s0 + $0x218] sm:$0xff]  ;;  %v302_v51 = vpack.c.bf16 %v16_v43, %v14_v42  ;;  %v15_v53 = vld [vmem:[%s4120_s0 + $0x10] sm:$0xff]  ;;  %v77_v54 = vld [vmem:[%s4120_s0 + $0x200] sm:$0xff]  ;;  %v480_v55 = vmax.bf16 %v2397_v12, %v336_v41  ;;  %v447_v62 = vmax.bf16 %v2397_v12, %v303_v47 }
  0x16   :  { %v334_v56 = vpack.c.bf16 %v80_v45, %v78_v44  ;;  %v79_v57 = vld [vmem:[%s4120_s0 + $0x210] sm:$0xff]  ;;  %v74_v58 = vld [vmem:[%s4120_s0 + $0x1e8] sm:$0xff]  ;;  %v76_v59 = vld [vmem:[%s4120_s0 + $0x1f8] sm:$0xff]  ;;  %v479_v63 = vmax.bf16 %v2397_v12, %v335_v48  ;;  %v301_v0 = vpack.c.bf16 %v15_v53, %v13_v52 }
  0x17   :  { %1270 = vmatpush1.bf16.msra.mxu0 %v451_v30  ;;  %v138_v60 = vld [vmem:[%s4120_s0 + $0x3e8] sm:$0xff]  ;;  %v140_v61 = vld [vmem:[%s4120_s0 + $0x3f8] sm:$0xff]  ;;  %v73_v1 = vld [vmem:[%s4120_s0 + $0x1e0] sm:$0xff]  ;;  %v446_v2 = vmax.bf16 %v2397_v12, %v302_v51  ;;  %v333_v3 = vpack.c.bf16 %v79_v57, %v77_v54  ;;  %v332_v4 = vpack.c.bf16 %v76_v59, %v74_v58 }
  0x18   :  { %1423 = vmatpush1.bf16.msra.mxu1 %v483_v31  ;;  %1271 = vmatprep.subr.bf16.mxu0 %v450_v34  ;;  %v75_v5 = vld [vmem:[%s4120_s0 + $0x1f0] sm:$0xff]  ;;  %v137_v6 = vld [vmem:[%s4120_s0 + $0x3e0] sm:$0xff]  ;;  %v478_v8 = vmax.bf16 %v2397_v12, %v334_v56  ;;  %v364_v9 = vpack.c.bf16 %v140_v61, %v138_v60  ;;  %v70_v10 = vld [vmem:[%s4120_s0 + $0x1c8] sm:$0xff]  ;;  %v445_v15 = vmax.bf16 %v2397_v12, %v301_v0 }
  0x19   :  { %1424 = vmatprep.subr.bf16.mxu1 %v482_v40  ;;  %v139_v7 = vld [vmem:[%s4120_s0 + $0x3f0] sm:$0xff]  ;;  %v72_v11 = vld [vmem:[%s4120_s0 + $0x1d8] sm:$0xff]  ;;  %v134_v13 = vld [vmem:[%s4120_s0 + $0x3c8] sm:$0xff]  ;;  %v331_v16 = vpack.c.bf16 %v75_v5, %v73_v1  ;;  %v477_v18 = vmax.bf16 %v2397_v12, %v333_v3  ;;  %v476_v19 = vmax.bf16 %v2397_v12, %v332_v4 }
  0x1a   :  { %v136_v14 = vld [vmem:[%s4120_s0 + $0x3d8] sm:$0xff]  ;;  %v363_v17 = vpack.c.bf16 %v139_v7, %v137_v6  ;;  %v330_v20 = vpack.c.bf16 %v72_v11, %v70_v10  ;;  %v69_v21 = vld [vmem:[%s4120_s0 + $0x1c0] sm:$0xff]  ;;  %v71_v22 = vld [vmem:[%s4120_s0 + $0x1d0] sm:$0xff]  ;;  %v508_v24 = vmax.bf16 %v2397_v12, %v364_v9 }
  0x1b   :  { %1272 = vmatpush1.bf16.msra.mxu0 %v449_v46  ;;  %v133_v23 = vld [vmem:[%s4120_s0 + $0x3c0] sm:$0xff]  ;;  %v362_v25 = vpack.c.bf16 %v136_v14, %v134_v13  ;;  %v135_v26 = vld [vmem:[%s4120_s0 + $0x3d0] sm:$0xff]  ;;  %v66_v27 = vld [vmem:[%s4120_s0 + $0x1a8] sm:$0xff]  ;;  %v475_v31 = vmax.bf16 %v2397_v12, %v331_v16  ;;  %v329_v33 = vpack.c.bf16 %v71_v22, %v69_v21 }
  0x1c   :  { %1425 = vmatpush1.bf16.msra.mxu1 %v481_v49  ;;  %1273 = vmatprep.subr.bf16.mxu0 %v448_v50  ;;  %v68_v28 = vld [vmem:[%s4120_s0 + $0x1b8] sm:$0xff]  ;;  %v130_v29 = vld [vmem:[%s4120_s0 + $0x3a8] sm:$0xff]  ;;  %v507_v32 = vmax.bf16 %v2397_v12, %v363_v17  ;;  %v65_v34 = vld [vmem:[%s4120_s0 + $0x1a0] sm:$0xff]  ;;  %v474_v35 = vmax.bf16 %v2397_v12, %v330_v20  ;;  %v361_v36 = vpack.c.bf16 %v135_v26, %v133_v23 }
  0x1d   :  { %1426 = vmatprep.subr.bf16.mxu1 %v480_v55  ;;  %v132_v30 = vld [vmem:[%s4120_s0 + $0x3b8] sm:$0xff]  ;;  %v328_v37 = vpack.c.bf16 %v68_v28, %v66_v27  ;;  %v67_v38 = vld [vmem:[%s4120_s0 + $0x1b0] sm:$0xff]  ;;  %v129_v39 = vld [vmem:[%s4120_s0 + $0x3a0] sm:$0xff]  ;;  %v506_v41 = vmax.bf16 %v2397_v12, %v362_v25  ;;  %v473_v47 = vmax.bf16 %v2397_v12, %v329_v33 }
  0x1e   :  { %v131_v40 = vld [vmem:[%s4120_s0 + $0x3b0] sm:$0xff]  ;;  %v360_v42 = vpack.c.bf16 %v132_v30, %v130_v29  ;;  %v62_v43 = vld [vmem:[%s4120_s0 + $0x188] sm:$0xff]  ;;  %v64_v44 = vld [vmem:[%s4120_s0 + $0x198] sm:$0xff]  ;;  %v327_v48 = vpack.c.bf16 %v67_v38, %v65_v34  ;;  %v505_v51 = vmax.bf16 %v2397_v12, %v361_v36 }
  0x1f   :  { %1274 = vmatpush1.bf16.msra.mxu0 %v447_v62  ;;  %v126_v45 = vld [vmem:[%s4120_s0 + $0x388] sm:$0xff]  ;;  %v128_v46 = vld [vmem:[%s4120_s0 + $0x398] sm:$0xff]  ;;  %v359_v49 = vpack.c.bf16 %v131_v40, %v129_v39  ;;  %v61_v50 = vld [vmem:[%s4120_s0 + $0x180] sm:$0xff]  ;;  %v472_v52 = vmax.bf16 %v2397_v12, %v328_v37  ;;  %v326_v53 = vpack.c.bf16 %v64_v44, %v62_v43 }
  0x20   :  { %1427 = vmatpush1.bf16.msra.mxu1 %v479_v63  ;;  %1275 = vmatprep.subr.bf16.mxu0 %v446_v2  ;;  %v63_v54 = vld [vmem:[%s4120_s0 + $0x190] sm:$0xff]  ;;  %v125_v55 = vld [vmem:[%s4120_s0 + $0x380] sm:$0xff]  ;;  %v504_v57 = vmax.bf16 %v2397_v12, %v360_v42  ;;  %v358_v58 = vpack.c.bf16 %v128_v46, %v126_v45  ;;  %v58_v59 = vld [vmem:[%s4120_s0 + $0x168] sm:$0xff]  ;;  %v471_v1 = vmax.bf16 %v2397_v12, %v327_v48 }
  0x21   :  { %1428 = vmatprep.subr.bf16.mxu1 %v478_v8  ;;  %v127_v56 = vld [vmem:[%s4120_s0 + $0x390] sm:$0xff]  ;;  %v60_v60 = vld [vmem:[%s4120_s0 + $0x178] sm:$0xff]  ;;  %v122_v61 = vld [vmem:[%s4120_s0 + $0x368] sm:$0xff]  ;;  %v503_v2 = vmax.bf16 %v2397_v12, %v359_v49  ;;  %v325_v3 = vpack.c.bf16 %v63_v54, %v61_v50  ;;  %v470_v6 = vmax.bf16 %v2397_v12, %v326_v53 }
  0x22   :  { %v124_v62 = vld [vmem:[%s4120_s0 + $0x378] sm:$0xff]  ;;  %v57_v63 = vld [vmem:[%s4120_s0 + $0x160] sm:$0xff]  ;;  %v59_v0 = vld [vmem:[%s4120_s0 + $0x170] sm:$0xff]  ;;  %v357_v7 = vpack.c.bf16 %v127_v56, %v125_v55  ;;  %v324_v8 = vpack.c.bf16 %v60_v60, %v58_v59  ;;  %v502_v11 = vmax.bf16 %v2397_v12, %v358_v58 }
  0x23   :  { %1276 = vmatpush1.bf16.msra.mxu0 %v445_v15  ;;  %v121_v4 = vld [vmem:[%s4120_s0 + $0x360] sm:$0xff]  ;;  %v123_v5 = vld [vmem:[%s4120_s0 + $0x370] sm:$0xff]  ;;  %v54_v9 = vld [vmem:[%s4120_s0 + $0x148] sm:$0xff]  ;;  %v356_v13 = vpack.c.bf16 %v124_v62, %v122_v61 }
  0x24   :  { %1429 = vmatpush1.bf16.msra.mxu1 %v477_v18  ;;  %1277 = vmatprep.subr.bf16.mxu0 %v476_v19  ;;  %v2221_v10 = vld [vmem:[%s4121_s1 + $0x4] ss:$36 sps:$4 sm:$0xff]   ;;  %v56_v14 = vld [vmem:[%s4120_s0 + $0x158] sm:$0xff]  ;;  %v2224_v17 = vld [vmem:[%s4121_s1 + $0xc] ss:$36 sps:$4 sm:$0xff]   ;;  %v469_v18 = vmax.bf16 %v2397_v12, %v325_v3  ;;  %v323_v19 = vpack.c.bf16 %v59_v0, %v57_v63  ;;  %v355_v20 = vpack.c.bf16 %v123_v5, %v121_v4 }
  0x25   :  { %1430 = vmatprep.subr.bf16.mxu1 %v508_v24  ;;  %v118_v15 = vld [vmem:[%s4120_s0 + $0x348] sm:$0xff]  ;;  %v120_v16 = vld [vmem:[%s4120_s0 + $0x358] sm:$0xff]  ;;  %1293 = vmatprep.mubr.bf16.mxu0 %v2221_v10  ;;  %v53_v21 = vld [vmem:[%s4120_s0 + $0x140] sm:$0xff]  ;;  %v501_v22 = vmax.bf16 %v2397_v12, %v357_v7  ;;  %v468_v23 = vmax.bf16 %v2397_v12, %v324_v8  ;;  %v322_v24 = vpack.c.bf16 %v56_v14, %v54_v9 }
  0x26   :  { %v55_v25 = vld [vmem:[%s4120_s0 + $0x150] sm:$0xff]  ;;  %v117_v26 = vld [vmem:[%s4120_s0 + $0x340] sm:$0xff]  ;;  %v500_v28 = vmax.bf16 %v2397_v12, %v356_v13  ;;  %v354_v29 = vpack.c.bf16 %v120_v16, %v118_v15  ;;  %v50_v30 = vld [vmem:[%s4120_s0 + $0x128] sm:$0xff]  ;;  %1446 = vmatprep.mubr.bf16.mxu1 %v2224_v17  ;;  %v467_v34 = vmax.bf16 %v2397_v12, %v323_v19 }
  0x27   :  { %1278 = vmatpush2.bf16.msra.mxu0 %v475_v31  ;;  %v119_v27 = vld [vmem:[%s4120_s0 + $0x350] sm:$0xff]  ;;  %v52_v31 = vld [vmem:[%s4120_s0 + $0x138] sm:$0xff]  ;;  %v321_v36 = vpack.c.bf16 %v55_v25, %v53_v21  ;;  %v49_v37 = vld [vmem:[%s4120_s0 + $0x120] sm:$0xff]  ;;  %v466_v38 = vmax.bf16 %v2397_v12, %v322_v24 }
  0x28   :  { %1431 = vmatpush2.bf16.msra.mxu1 %v507_v32  ;;  %1279 = vmatprep.subr.bf16.mxu0 %v474_v35  ;;  %v114_v32 = vld [vmem:[%s4120_s0 + $0x328] sm:$0xff]  ;;  %v116_v33 = vld [vmem:[%s4120_s0 + $0x338] sm:$0xff]  ;;  %v499_v35 = vmax.bf16 %v2397_v12, %v355_v20  ;;  %v353_v39 = vpack.c.bf16 %v119_v27, %v117_v26  ;;  %v320_v40 = vpack.c.bf16 %v52_v31, %v50_v30  ;;  %v113_v42 = vld [vmem:[%s4120_s0 + $0x320] sm:$0xff] }
  0x29   :  { %1432 = vmatprep.subr.bf16.mxu1 %v506_v41  ;;  %v51_v41 = vld [vmem:[%s4120_s0 + $0x130] sm:$0xff]  ;;  %v498_v44 = vmax.bf16 %v2397_v12, %v354_v29  ;;  %v352_v45 = vpack.c.bf16 %v116_v33, %v114_v32  ;;  %v46_v46 = vld [vmem:[%s4120_s0 + $0x108] sm:$0xff]  ;;  %v112_v49 = vld [vmem:[%s4120_s0 + $0x318] sm:$0xff]  ;;  %v465_v50 = vmax.bf16 %v2397_v12, %v321_v36 }
  0x2a   :  { %v115_v43 = vld [vmem:[%s4120_s0 + $0x330] sm:$0xff]  ;;  %v110_v48 = vld [vmem:[%s4120_s0 + $0x308] sm:$0xff]  ;;  %v45_v53 = vld [vmem:[%s4120_s0 + $0x100] sm:$0xff]  ;;  %v497_v56 = vmax.bf16 %v2397_v12, %v353_v39 }
  0x2b   :  { %1280 = vmatpush2.bf16.msra.mxu0 %v473_v47  ;;  %v48_v47 = vld [vmem:[%s4120_s0 + $0x118] sm:$0xff]  ;;  %v47_v54 = vld [vmem:[%s4120_s0 + $0x110] sm:$0xff]  ;;  %v109_v55 = vld [vmem:[%s4120_s0 + $0x300] sm:$0xff]  ;;  %v496_v62 = vmax.bf16 %v2397_v12, %v352_v45  ;;  %v350_v63 = vpack.c.bf16 %v112_v49, %v110_v48 }
  0x2c   :  { %1433 = vmatpush2.bf16.msra.mxu1 %v505_v51  ;;  %1281 = vmatprep.subr.bf16.mxu0 %v472_v52  ;;  %v319_v51 = vpack.c.bf16 %v51_v41, %v49_v37  ;;  %v351_v52 = vpack.c.bf16 %v115_v43, %v113_v42  ;;  %v318_v58 = vpack.c.bf16 %v48_v47, %v46_v46  ;;  %v111_v59 = vld [vmem:[%s4120_s0 + $0x310] sm:$0xff]  ;;  %v170_v60 = vld [vmem:[%s4120_s0 + $0x4e8] sm:$0xff]  ;;  %v172_v61 = vld [vmem:[%s4120_s0 + $0x4f8] sm:$0xff] }
  0x2d   :  { %1434 = vmatprep.subr.bf16.mxu1 %v504_v57  ;;  %v464_v57 = vmax.bf16 %v2397_v12, %v320_v40  ;;  %v234_v0 = vld [vmem:[%s4120_s0 + $0x6e8] sm:$0xff]  ;;  %v317_v4 = vpack.c.bf16 %v47_v54, %v45_v53  ;;  %v169_v5 = vld [vmem:[%s4120_s0 + $0x4e0] sm:$0xff]  ;;  %v349_v7 = vpack.c.bf16 %v111_v59, %v109_v55  ;;  %v380_v8 = vpack.c.bf16 %v172_v61, %v170_v60  ;;  %v171_v9 = vld [vmem:[%s4120_s0 + $0x4f0] sm:$0xff] }
  0x2e   :  { %v495_v3 = vmax.bf16 %v2397_v12, %v351_v52  ;;  %v233_v10 = vld [vmem:[%s4120_s0 + $0x6e0] sm:$0xff]  ;;  %v494_v13 = vmax.bf16 %v2397_v12, %v350_v63  ;;  %v166_v15 = vld [vmem:[%s4120_s0 + $0x4c8] sm:$0xff]  ;;  %v168_v16 = vld [vmem:[%s4120_s0 + $0x4d8] sm:$0xff]  ;;  %v379_v20 = vpack.c.bf16 %v171_v9, %v169_v5 }
  0x2f   :  { %1282 = vmatpush2.bf16.msra.mxu0 %v471_v1  ;;  %v236_v1 = vld [vmem:[%s4120_s0 + $0x6f8] sm:$0xff]  ;;  %v230_v17 = vld [vmem:[%s4120_s0 + $0x6c8] sm:$0xff]  ;;  %v461_v19 = vmax.bf16 %v2397_v12, %v317_v4  ;;  %v378_v24 = vpack.c.bf16 %v168_v16, %v166_v15  ;;  %v165_v25 = vld [vmem:[%s4120_s0 + $0x4c0] sm:$0xff] }
  0x30   :  { %1435 = vmatpush2.bf16.msra.mxu1 %v503_v2  ;;  %1283 = vmatprep.subr.bf16.mxu0 %v470_v6  ;;  %v463_v2 = vmax.bf16 %v2397_v12, %v319_v51  ;;  %v462_v6 = vmax.bf16 %v2397_v12, %v318_v58  ;;  %v412_v14 = vpack.c.bf16 %v236_v1, %v234_v0  ;;  %v167_v26 = vld [vmem:[%s4120_s0 + $0x4d0] sm:$0xff]  ;;  %v229_v27 = vld [vmem:[%s4120_s0 + $0x6c0] sm:$0xff]  ;;  %v162_v31 = vld [vmem:[%s4120_s0 + $0x4a8] sm:$0xff] }
  0x31   :  { %1436 = vmatprep.subr.bf16.mxu1 %v502_v11  ;;  %v235_v11 = vld [vmem:[%s4120_s0 + $0x6f0] sm:$0xff]  ;;  %v164_v32 = vld [vmem:[%s4120_s0 + $0x4b8] sm:$0xff]  ;;  %v2219_v33 = vld [vmem:[%s4121_s1] ss:$36 sps:$4 sm:$0xff]   ;;  %v523_v37 = vmax.bf16 %v2397_v12, %v379_v20  ;;  %v377_v40 = vpack.c.bf16 %v167_v26, %v165_v25  ;;  %v522_v42 = vmax.bf16 %v2397_v12, %v378_v24 }
  0x32   :  { %v411_v21 = vpack.c.bf16 %v235_v11, %v233_v10  ;;  %v231_v30 = vld [vmem:[%s4120_s0 + $0x6d0] sm:$0xff]  ;;  %v2222_v36 = vld [vmem:[%s4121_s1 + $0x8] ss:$36 sps:$4 sm:$0xff]   ;;  %v161_v41 = vld [vmem:[%s4120_s0 + $0x4a0] sm:$0xff]  ;;  %v376_v45 = vpack.c.bf16 %v164_v32, %v162_v31 }
  0x33   :  { %1284 = vmatpush2.bf16.msra.mxu0 %v469_v18  ;;  %v232_v18 = vld [vmem:[%s4120_s0 + $0x6d8] sm:$0xff]  ;;  %v2225_v39 = vld [vmem:[%s4121_s1 + $0x4c] ss:$36 sps:$4 sm:$0xff]   ;;  %v225_v47 = vld [vmem:[%s4120_s0 + $0x6a0] sm:$0xff]  ;;  %v521_v53 = vmax.bf16 %v2397_v12, %v377_v40 }
  0x34   :  { %1437 = vmatpush2.bf16.msra.mxu1 %v501_v22  ;;  %1285 = vmatprep.subr.bf16.mxu0 %v468_v23  ;;  %v493_v22 = vmax.bf16 %v2397_v12, %v349_v7  ;;  %v524_v23 = vmax.bf16 %v2397_v12, %v380_v8  ;;  %v410_v29 = vpack.c.bf16 %v232_v18, %v230_v17  ;;  %v2227_v43 = vld [vmem:[%s4121_s1 + $0x54] ss:$36 sps:$4 sm:$0xff]   ;;  %v158_v51 = vld [vmem:[%s4120_s0 + $0x488] sm:$0xff]  ;;  %v157_v61 = vld [vmem:[%s4120_s0 + $0x480] sm:$0xff] }
  0x35   :  { %1438 = vmatprep.subr.bf16.mxu1 %v500_v28  ;;  %v556_v28 = vmax.bf16 %v2397_v12, %v412_v14  ;;  %v163_v46 = vld [vmem:[%s4120_s0 + $0x4b0] sm:$0xff]  ;;  %v160_v52 = vld [vmem:[%s4120_s0 + $0x498] sm:$0xff]  ;;  %v222_v55 = vld [vmem:[%s4120_s0 + $0x688] sm:$0xff]  ;;  %v520_v59 = vmax.bf16 %v2397_v12, %v376_v45 }
  0x36   :  { %v227_v48 = vld [vmem:[%s4120_s0 + $0x6b0] sm:$0xff]  ;;  %v554_v49 = vmax.bf16 %v2397_v12, %v410_v29  ;;  %v375_v54 = vpack.c.bf16 %v163_v46, %v161_v41  ;;  %v2229_v58 = vld [vmem:[%s4121_s1 + $0x48] ss:$36 sps:$4 sm:$0xff]   ;;  %v221_v63 = vld [vmem:[%s4120_s0 + $0x680] sm:$0xff]  ;;  %v374_v1 = vpack.c.bf16 %v160_v52, %v158_v51 }
  0x37   :  { %1286 = vmatpush2.bf16.msra.mxu0 %v467_v34  ;;  %v226_v34 = vld [vmem:[%s4120_s0 + $0x6a8] sm:$0xff]  ;;  %v407_v60 = vpack.c.bf16 %v227_v48, %v225_v47  ;;  %v156_v4 = vld [vmem:[%s4120_s0 + $0x478] sm:$0xff]  ;;  %v2230_v5 = vld [vmem:[%s4121_s1 + $0x50] ss:$36 sps:$4 sm:$0xff]  }
  0x38   :  { %1439 = vmatpush2.bf16.msra.mxu1 %v499_v35  ;;  %1287 = vmatprep.subr.bf16.mxu0 %v466_v38  ;;  %v228_v35 = vld [vmem:[%s4120_s0 + $0x6b8] sm:$0xff]  ;;  %v555_v38 = vmax.bf16 %v2397_v12, %v411_v21  ;;  %v218_v7 = vld [vmem:[%s4120_s0 + $0x668] sm:$0xff]  ;;  %v519_v9 = vmax.bf16 %v2397_v12, %v375_v54  ;;  %v153_v17 = vld [vmem:[%s4120_s0 + $0x460] sm:$0xff]  ;;  %v518_v18 = vmax.bf16 %v2397_v12, %v374_v1 }
  0x39   :  { %1440 = vmatprep.subr.bf16.mxu1 %v498_v44  ;;  %v409_v44 = vpack.c.bf16 %v231_v30, %v229_v27  ;;  %v220_v8 = vld [vmem:[%s4120_s0 + $0x678] sm:$0xff]  ;;  %v551_v14 = vmax.bf16 %v2397_v12, %v407_v60  ;;  %v155_v20 = vld [vmem:[%s4120_s0 + $0x470] sm:$0xff]  ;;  %v217_v21 = vld [vmem:[%s4120_s0 + $0x660] sm:$0xff] }
  0x3a   :  { %v2231_v10 = vld [vmem:[%s4121_s1 + $0x94] ss:$36 sps:$4 sm:$0xff]   ;;  %v2233_v11 = vld [vmem:[%s4121_s1 + $0x9c] ss:$36 sps:$4 sm:$0xff]   ;;  %v150_v24 = vld [vmem:[%s4120_s0 + $0x448] sm:$0xff] }
  0x3b   :  { %1288 = vmatpush2.bf16.msra.mxu0 %v465_v50  ;;  %v408_v50 = vpack.c.bf16 %v228_v35, %v226_v34  ;;  %v152_v25 = vld [vmem:[%s4120_s0 + $0x458] sm:$0xff]  ;;  %v214_v27 = vld [vmem:[%s4120_s0 + $0x648] sm:$0xff]  ;;  %v149_v29 = vld [vmem:[%s4120_s0 + $0x440] sm:$0xff] }
  0x3c   :  { %1441 = vmatpush2.bf16.msra.mxu1 %v497_v56  ;;  %1289 = vmatprep.subr.bf16.mxu0 %v464_v57  ;;  %v224_v56 = vld [vmem:[%s4120_s0 + $0x698] sm:$0xff]  ;;  %v553_v57 = vmax.bf16 %v2397_v12, %v409_v44  ;;  %v2235_v30 = vld [vmem:[%s4121_s1 + $0x90] ss:$36 sps:$4 sm:$0xff]   ;;  %v213_v35 = vld [vmem:[%s4120_s0 + $0x640] sm:$0xff]  ;;  %v370_v40 = vpack.c.bf16 %v152_v25, %v150_v24 }
  0x3d   :  { %1442 = vmatprep.subr.bf16.mxu1 %v496_v62  ;;  %v159_v62 = vld [vmem:[%s4120_s0 + $0x490] sm:$0xff]  ;;  %v552_v0 = vmax.bf16 %v2397_v12, %v408_v50  ;;  %v146_v41 = vld [vmem:[%s4120_s0 + $0x428] sm:$0xff]  ;;  %v2237_v44 = vld [vmem:[%s4121_s1 + $0xdc] ss:$36 sps:$4 sm:$0xff]  }
  0x3e   :  { %v151_v34 = vld [vmem:[%s4120_s0 + $0x450] sm:$0xff]  ;;  %v210_v45 = vld [vmem:[%s4120_s0 + $0x628] sm:$0xff]  ;;  %v212_v46 = vld [vmem:[%s4120_s0 + $0x638] sm:$0xff]  ;;  %v514_v52 = vmax.bf16 %v2397_v12, %v370_v40 }
  0x3f   :  { %1290 = vmatpush2.bf16.msra.mxu0 %v463_v2  ;;  %v223_v2 = vld [vmem:[%s4120_s0 + $0x690] sm:$0xff]  ;;  %v2239_v47 = vld [vmem:[%s4121_s1 + $0xe4] ss:$36 sps:$4 sm:$0xff]  }
  0x40   :  { %1443 = vmatpush2.bf16.msra.mxu1 %v495_v3  ;;  %1291 = vmatprep.subr.bf16.mxu0 %v462_v6  ;;  %v154_v3 = vld [vmem:[%s4120_s0 + $0x468] sm:$0xff]  ;;  %v406_v6 = vpack.c.bf16 %v224_v56, %v222_v55  ;;  %v405_v15 = vpack.c.bf16 %v223_v2, %v221_v63  ;;  %v145_v50 = vld [vmem:[%s4120_s0 + $0x420] sm:$0xff]  ;;  %v147_v55 = vld [vmem:[%s4120_s0 + $0x430] sm:$0xff] }
  0x41   :  { %1444 = vmatprep.subr.bf16.mxu1 %v494_v13  ;;  %v373_v13 = vpack.c.bf16 %v159_v62, %v157_v61  ;;  %v372_v16 = vpack.c.bf16 %v156_v4, %v154_v3  ;;  %v209_v56 = vld [vmem:[%s4120_s0 + $0x620] sm:$0xff]  ;;  %v142_v60 = vld [vmem:[%s4120_s0 + $0x408] sm:$0xff]  ;;  %v144_v61 = vld [vmem:[%s4120_s0 + $0x418] sm:$0xff]  ;;  %v367_v2 = vpack.c.bf16 %v147_v55, %v145_v50 }
  0x42   :  { %v549_v31 = vmax.bf16 %v2397_v12, %v405_v15  ;;  %v206_v62 = vld [vmem:[%s4120_s0 + $0x608] sm:$0xff]  ;;  %v208_v63 = vld [vmem:[%s4120_s0 + $0x618] sm:$0xff]  ;;  %v141_v4 = vld [vmem:[%s4120_s0 + $0x400] sm:$0xff] }
  0x43   :  { %1292 = vmatpush2.bf16.msra.mxu0 %v461_v19  ;;  %v404_v19 = vpack.c.bf16 %v220_v8, %v218_v7  ;;  %v517_v26 = vmax.bf16 %v2397_v12, %v373_v13  ;;  %v516_v32 = vmax.bf16 %v2397_v12, %v372_v16  ;;  %v207_v15 = vld [vmem:[%s4120_s0 + $0x610] sm:$0xff]  ;;  %v202_v16 = vld [vmem:[%s4120_s0 + $0x5e8] sm:$0xff]  ;;  %v201_v24 = vld [vmem:[%s4120_s0 + $0x5e0] sm:$0xff] }
  0x44   :  { %1445 = vmatpush2.bf16.msra.mxu1 %v493_v22  ;;  %1567 = vmatprep.subr.bf16.mxu0 %v524_v23  ;;  %v550_v22 = vmax.bf16 %v2397_v12, %v406_v6  ;;  %v219_v23 = vld [vmem:[%s4120_s0 + $0x670] sm:$0xff]  ;;  %v2243_v6 = vld [vmem:[%s4121_s1 + $0x124] ss:$36 sps:$4 sm:$0xff]  }
  0x45   :  { %1720 = vmatprep.subr.bf16.mxu1 %v556_v28  ;;  %v216_v28 = vld [vmem:[%s4120_s0 + $0x658] sm:$0xff]  ;;  %v203_v25 = vld [vmem:[%s4120_s0 + $0x5f0] sm:$0xff]  ;;  %v258_v55 = vld [vmem:[%s4120_s0 + $0x7a8] sm:$0xff] }
  0x46   :  { %1294 = vmatmul.mubr.bf16.vlgmr.msra.gmra.mxu0 %v2219_v33  ;;  %v371_v33 = vpack.c.bf16 %v155_v20, %v153_v17  ;;  %v204_v17 = vld [vmem:[%s4120_s0 + $0x5f8] sm:$0xff] }
  0x47   :  { %1447 = vmatmul.mubr.bf16.vlgmr.msra.gmra.mxu1 %v2222_v36  ;;  %1568 = vmatpush1.bf16.msra.mxu0 %v523_v37  ;;  %v215_v36 = vld [vmem:[%s4120_s0 + $0x650] sm:$0xff]  ;;  %v2236_v37 = vld [vmem:[%s4121_s1 + $0x98] ss:$36 sps:$4 sm:$0xff]  }
  0x48   :  { %1721 = vmatpush1.bf16.msra.mxu1 %v555_v38  ;;  %1569 = vmatprep.subr.bf16.mxu0 %v522_v42  ;;  %v548_v38 = vmax.bf16 %v2397_v12, %v404_v19  ;;  %v402_v42 = vpack.c.bf16 %v216_v28, %v214_v27  ;;  %v515_v48 = vmax.bf16 %v2397_v12, %v371_v33  ;;  %v266_v19 = vld [vmem:[%s4120_s0 + $0x7e8] sm:$0xff]  ;;  %v268_v20 = vld [vmem:[%s4120_s0 + $0x7f8] sm:$0xff] }
  0x49   :  { %1722 = vmatprep.subr.bf16.mxu1 %v554_v49  ;;  %1303 = vmatprep.mubr.bf16.mxu0 %v2225_v39  ;;  %v403_v39 = vpack.c.bf16 %v219_v23, %v217_v21  ;;  %v369_v49 = vpack.c.bf16 %v151_v34, %v149_v29  ;;  %v511_v21 = vmax.bf16 %v2397_v12, %v367_v2  ;;  %v2251_v50 = vld [vmem:[%s4121_s1 + $0x174] ss:$36 sps:$4 sm:$0xff]  }
  0x4a   :  { %1456 = vmatprep.mubr.bf16.mxu1 %v2227_v43  ;;  %v148_v43 = vld [vmem:[%s4120_s0 + $0x438] sm:$0xff]  ;;  %v396_v29 = vpack.c.bf16 %v204_v17, %v202_v16  ;;  %v428_v34 = vpack.c.bf16 %v268_v20, %v266_v19  ;;  %v259_v2 = vld [vmem:[%s4120_s0 + $0x7b0] sm:$0xff]  ;;  %v253_v16 = vld [vmem:[%s4120_s0 + $0x780] sm:$0xff] }
  0x4b   :  { %1570 = vmatpush1.bf16.msra.mxu0 %v521_v53  ;;  %v547_v51 = vmax.bf16 %v2397_v12, %v403_v39  ;;  %v401_v53 = vpack.c.bf16 %v215_v36, %v213_v35  ;;  %v368_v54 = vpack.c.bf16 %v148_v43, %v146_v41  ;;  %v513_v1 = vmax.bf16 %v2397_v12, %v369_v49  ;;  %v262_v35 = vld [vmem:[%s4120_s0 + $0x7c8] sm:$0xff]  ;;  %v264_v36 = vld [vmem:[%s4120_s0 + $0x7d8] sm:$0xff]  ;;  %v197_v41 = vld [vmem:[%s4120_s0 + $0x5c0] sm:$0xff] }
  0x4c   :  { %1723 = vmatpush1.bf16.msra.mxu1 %v553_v57  ;;  %1571 = vmatprep.subr.bf16.mxu0 %v520_v59  ;;  %v211_v57 = vld [vmem:[%s4120_s0 + $0x630] sm:$0xff]  ;;  %v400_v59 = vpack.c.bf16 %v212_v46, %v210_v45  ;;  %v395_v39 = vpack.c.bf16 %v203_v25, %v201_v24  ;;  %v540_v45 = vmax.bf16 %v2397_v12, %v396_v29  ;;  %v188_v24 = vld [vmem:[%s4120_s0 + $0x578] sm:$0xff] }
  0x4d   :  { %1724 = vmatprep.subr.bf16.mxu1 %v552_v0  ;;  %v2241_v0 = vld [vmem:[%s4121_s1 + $0xd8] ss:$36 sps:$4 sm:$0xff]   ;;  %v399_v3 = vpack.c.bf16 %v211_v57, %v209_v56  ;;  %v545_v7 = vmax.bf16 %v2397_v12, %v401_v53  ;;  %v512_v8 = vmax.bf16 %v2397_v12, %v368_v54  ;;  %v2249_v43 = vld [vmem:[%s4121_s1 + $0x16c] ss:$36 sps:$4 sm:$0xff]   ;;  %v193_v57 = vld [vmem:[%s4120_s0 + $0x5a0] sm:$0xff] }
  0x4e   :  { %1304 = vmatmul.mubr.bf16.gmra.mxu0 %v2229_v58  ;;  %v546_v58 = vmax.bf16 %v2397_v12, %v402_v42  ;;  %v544_v13 = vmax.bf16 %v2397_v12, %v400_v59  ;;  %v2248_v42 = vld [vmem:[%s4121_s1 + $0x128] ss:$36 sps:$4 sm:$0xff]   ;;  %v263_v49 = vld [vmem:[%s4120_s0 + $0x7d0] sm:$0xff]  ;;  %v196_v54 = vld [vmem:[%s4120_s0 + $0x5b8] sm:$0xff] }
  0x4f   :  { %1457 = vmatmul.mubr.bf16.gmra.mxu1 %v2230_v5  ;;  %1572 = vmatpush1.bf16.msra.mxu0 %v519_v9  ;;  %v2242_v5 = vld [vmem:[%s4121_s1 + $0xe0] ss:$36 sps:$4 sm:$0xff]   ;;  %v366_v9 = vpack.c.bf16 %v144_v61, %v142_v60  ;;  %v194_v53 = vld [vmem:[%s4120_s0 + $0x5a8] sm:$0xff]  ;;  %v260_v56 = vld [vmem:[%s4120_s0 + $0x7b8] sm:$0xff] }
  0x50   :  { %1725 = vmatpush1.bf16.msra.mxu1 %v551_v14  ;;  %1313 = vmatprep.mubr.bf16.mxu0 %v2231_v10  ;;  %v143_v10 = vld [vmem:[%s4120_s0 + $0x410] sm:$0xff]  ;;  %v398_v14 = vpack.c.bf16 %v208_v63, %v206_v62  ;;  %v2257_v29 = vld [vmem:[%s4121_s1 + $0x1bc] ss:$36 sps:$4 sm:$0xff]  }
  0x51   :  { %1466 = vmatprep.mubr.bf16.mxu1 %v2233_v11  ;;  %1573 = vmatprep.subr.bf16.mxu0 %v518_v18  ;;  %v205_v11 = vld [vmem:[%s4120_s0 + $0x600] sm:$0xff]  ;;  %v2245_v18 = vld [vmem:[%s4121_s1 + $0x12c] ss:$36 sps:$4 sm:$0xff]   ;;  %v365_v23 = vpack.c.bf16 %v143_v10, %v141_v4  ;;  %v510_v27 = vmax.bf16 %v2397_v12, %v366_v9  ;;  %v424_v4 = vpack.c.bf16 %v260_v56, %v258_v55 }
  0x52   :  { %1726 = vmatprep.subr.bf16.mxu1 %v550_v22  ;;  %v543_v22 = vmax.bf16 %v2397_v12, %v399_v3  ;;  %v397_v28 = vpack.c.bf16 %v207_v15, %v205_v11  ;;  %v542_v33 = vmax.bf16 %v2397_v12, %v398_v14  ;;  %v195_v61 = vld [vmem:[%s4120_s0 + $0x5b0] sm:$0xff]  ;;  %v2253_v9 = vld [vmem:[%s4121_s1 + $0x168] ss:$36 sps:$4 sm:$0xff]   ;;  %v189_v14 = vld [vmem:[%s4120_s0 + $0x580] sm:$0xff] }
  0x53   :  { %1574 = vmatpush1.bf16.msra.mxu0 %v517_v26  ;;  %v265_v26 = vld [vmem:[%s4120_s0 + $0x7e0] sm:$0xff]  ;;  %v391_v11 = vpack.c.bf16 %v195_v61, %v193_v57  ;;  %v191_v15 = vld [vmem:[%s4120_s0 + $0x590] sm:$0xff]  ;;  %v568_v25 = vmax.bf16 %v2397_v12, %v424_v4  ;;  %v180_v61 = vld [vmem:[%s4120_s0 + $0x538] sm:$0xff] }
  0x54   :  { %1727 = vmatpush1.bf16.msra.mxu1 %v549_v31  ;;  %1575 = vmatprep.subr.bf16.mxu0 %v516_v32  ;;  %v198_v31 = vld [vmem:[%s4120_s0 + $0x5c8] sm:$0xff]  ;;  %v200_v32 = vld [vmem:[%s4120_s0 + $0x5d8] sm:$0xff]  ;;  %v2254_v17 = vld [vmem:[%s4121_s1 + $0x170] ss:$36 sps:$4 sm:$0xff]  }
  0x55   :  { %1728 = vmatprep.subr.bf16.mxu1 %v548_v38  ;;  %v509_v38 = vmax.bf16 %v2397_v12, %v365_v23  ;;  %v394_v46 = vpack.c.bf16 %v200_v32, %v198_v31  ;;  %v186_v23 = vld [vmem:[%s4120_s0 + $0x568] sm:$0xff]  ;;  %v389_v32 = vpack.c.bf16 %v191_v15, %v189_v14 }
  0x56   :  { %1314 = vmatmul.mubr.bf16.gmra.mxu0 %v2235_v30  ;;  %v267_v30 = vld [vmem:[%s4120_s0 + $0x7f0] sm:$0xff] }
  0x57   :  { %1467 = vmatmul.mubr.bf16.gmra.mxu1 %v2236_v37  ;;  %1323 = vmatprep.mubr.bf16.mxu0 %v2237_v44  ;;  %v2247_v37 = vld [vmem:[%s4121_s1 + $0x120] ss:$36 sps:$4 sm:$0xff]   ;;  %v427_v40 = vpack.c.bf16 %v267_v30, %v265_v26  ;;  %v541_v44 = vmax.bf16 %v2397_v12, %v397_v28  ;;  %v538_v62 = vmax.bf16 %v2397_v12, %v394_v46  ;;  %v252_v28 = vld [vmem:[%s4120_s0 + $0x778] sm:$0xff] }
  0x58   :  { %1476 = vmatprep.mubr.bf16.mxu1 %v2239_v47  ;;  %1576 = vmatpush1.bf16.msra.mxu0 %v515_v48  ;;  %v199_v47 = vld [vmem:[%s4120_s0 + $0x5d0] sm:$0xff]  ;;  %v261_v48 = vld [vmem:[%s4120_s0 + $0x7c0] sm:$0xff]  ;;  %v535_v30 = vmax.bf16 %v2397_v12, %v391_v11 }
  0x59   :  { %1729 = vmatpush1.bf16.msra.mxu1 %v547_v51  ;;  %1577 = vmatprep.subr.bf16.mxu0 %v514_v52  ;;  %v572_v51 = vmax.bf16 %v2397_v12, %v428_v34  ;;  %v426_v52 = vpack.c.bf16 %v264_v36, %v262_v35  ;;  %v571_v59 = vmax.bf16 %v2397_v12, %v427_v40  ;;  %v181_v46 = vld [vmem:[%s4120_s0 + $0x540] sm:$0xff]  ;;  %v243_v11 = vld [vmem:[%s4120_s0 + $0x730] sm:$0xff] }
  0x5a   :  { %1730 = vmatprep.subr.bf16.mxu1 %v546_v58  ;;  %v539_v58 = vmax.bf16 %v2397_v12, %v395_v39  ;;  %v393_v60 = vpack.c.bf16 %v199_v47, %v197_v41  ;;  %v425_v63 = vpack.c.bf16 %v263_v49, %v261_v48  ;;  %v388_v36 = vpack.c.bf16 %v188_v24, %v186_v23  ;;  %v251_v39 = vld [vmem:[%s4120_s0 + $0x770] sm:$0xff]  ;;  %v173_v23 = vld [vmem:[%s4120_s0 + $0x500] sm:$0xff] }
  0x5b   :  { %v570_v3 = vmax.bf16 %v2397_v12, %v426_v52  ;;  %v2259_v47 = vld [vmem:[%s4121_s1 + $0x1b0] ss:$36 sps:$4 sm:$0xff]   ;;  %v533_v48 = vmax.bf16 %v2397_v12, %v389_v32  ;;  %v245_v52 = vld [vmem:[%s4120_s0 + $0x740] sm:$0xff] }
  0x5c   :  { %1578 = vmatpush1.bf16.msra.mxu0 %v513_v1  ;;  %v257_v1 = vld [vmem:[%s4120_s0 + $0x7a0] sm:$0xff]  ;;  %v537_v10 = vmax.bf16 %v2397_v12, %v393_v60  ;;  %v569_v19 = vmax.bf16 %v2397_v12, %v425_v63  ;;  %v532_v56 = vmax.bf16 %v2397_v12, %v388_v36  ;;  %v242_v63 = vld [vmem:[%s4120_s0 + $0x728] sm:$0xff]  ;;  %v175_v24 = vld [vmem:[%s4120_s0 + $0x510] sm:$0xff] }
  0x5d   :  { %1731 = vmatpush1.bf16.msra.mxu1 %v545_v7  ;;  %1579 = vmatprep.subr.bf16.mxu0 %v512_v8  ;;  %v254_v7 = vld [vmem:[%s4120_s0 + $0x788] sm:$0xff]  ;;  %v256_v8 = vld [vmem:[%s4120_s0 + $0x798] sm:$0xff] }
  0x5e   :  { %1324 = vmatmul.mubr.bf16.gmra.mxu0 %v2241_v0  ;;  %1732 = vmatprep.subr.bf16.mxu1 %v544_v13  ;;  %v392_v0 = vpack.c.bf16 %v196_v54, %v194_v53  ;;  %v423_v13 = vpack.c.bf16 %v259_v2, %v257_v1  ;;  %v422_v26 = vpack.c.bf16 %v256_v8, %v254_v7  ;;  %v247_v53 = vld [vmem:[%s4120_s0 + $0x750] sm:$0xff]  ;;  %v2260_v54 = vld [vmem:[%s4121_s1 + $0x1b8] ss:$36 sps:$4 sm:$0xff]   ;;  %v2263_v1 = vld [vmem:[%s4121_s1 + $0x204] ss:$36 sps:$4 sm:$0xff]  }
  0x5f   :  { %1477 = vmatmul.mubr.bf16.gmra.mxu1 %v2242_v5  ;;  %1333 = vmatprep.mubr.bf16.mxu0 %v2243_v6  ;;  %v190_v5 = vld [vmem:[%s4120_s0 + $0x588] sm:$0xff]  ;;  %v192_v6 = vld [vmem:[%s4120_s0 + $0x598] sm:$0xff]  ;;  %v417_v8 = vpack.c.bf16 %v247_v53, %v245_v52  ;;  %v2278_v52 = vld [vmem:[%s4121_s1 + $0x290] ss:$36 sps:$4 sm:$0xff]  }
  0x60   :  { %1486 = vmatprep.mubr.bf16.mxu1 %v2245_v18  ;;  %1580 = vmatpush1.bf16.msra.mxu0 %v511_v21  ;;  %v2255_v18 = vld [vmem:[%s4121_s1 + $0x1b4] ss:$36 sps:$4 sm:$0xff]   ;;  %v536_v20 = vmax.bf16 %v2397_v12, %v392_v0  ;;  %v390_v21 = vpack.c.bf16 %v192_v6, %v190_v5  ;;  %v567_v31 = vmax.bf16 %v2397_v12, %v423_v13  ;;  %v177_v5 = vld [vmem:[%s4120_s0 + $0x520] sm:$0xff]  ;;  %v174_v13 = vld [vmem:[%s4120_s0 + $0x508] sm:$0xff] }
  0x61   :  { %1733 = vmatpush1.bf16.msra.mxu1 %v543_v22  ;;  %1581 = vmatprep.subr.bf16.mxu0 %v510_v27  ;;  %v255_v22 = vld [vmem:[%s4120_s0 + $0x790] sm:$0xff]  ;;  %v250_v27 = vld [vmem:[%s4120_s0 + $0x768] sm:$0xff]  ;;  %v566_v40 = vmax.bf16 %v2397_v12, %v422_v26  ;;  %v244_v0 = vld [vmem:[%s4120_s0 + $0x738] sm:$0xff]  ;;  %v561_v26 = vmax.bf16 %v2397_v12, %v417_v8 }
  0x62   :  { %1734 = vmatprep.subr.bf16.mxu1 %v542_v33  ;;  %v185_v33 = vld [vmem:[%s4120_s0 + $0x560] sm:$0xff]  ;;  %v534_v34 = vmax.bf16 %v2397_v12, %v390_v21  ;;  %v421_v35 = vpack.c.bf16 %v255_v22, %v253_v16  ;;  %v420_v41 = vpack.c.bf16 %v252_v28, %v250_v27  ;;  %v179_v6 = vld [vmem:[%s4120_s0 + $0x530] sm:$0xff]  ;;  %v416_v15 = vpack.c.bf16 %v244_v0, %v242_v63  ;;  %v176_v16 = vld [vmem:[%s4120_s0 + $0x518] sm:$0xff] }
  0x63   :  { %v383_v21 = vpack.c.bf16 %v179_v6, %v177_v5  ;;  %v382_v28 = vpack.c.bf16 %v176_v16, %v174_v13  ;;  %v2269_v36 = vld [vmem:[%s4121_s1 + $0x24c] ss:$36 sps:$4 sm:$0xff]   ;;  %v2279_v53 = vld [vmem:[%s4121_s1 + $0x2d4] ss:$36 sps:$4 sm:$0xff]   ;;  %v297_v63 = vld [vmem:[%s4120_s0 + $0x8e0] sm:$0xff] }
  0x64   :  { %1582 = vmatpush1.bf16.msra.mxu0 %v509_v38  ;;  %v249_v38 = vld [vmem:[%s4120_s0 + $0x760] sm:$0xff]  ;;  %v565_v55 = vmax.bf16 %v2397_v12, %v421_v35  ;;  %v560_v32 = vmax.bf16 %v2397_v12, %v416_v15  ;;  %v299_v0 = vld [vmem:[%s4120_s0 + $0x8f0] sm:$0xff]  ;;  %v2294_v8 = vld [vmem:[%s4121_s1 + $0x18] ss:$36 sps:$4 sm:$0xff]  }
  0x65   :  { %1735 = vmatpush1.bf16.msra.mxu1 %v541_v44  ;;  %1583 = vmatprep.subr.bf16.mxu0 %v540_v45  ;;  %v246_v44 = vld [vmem:[%s4120_s0 + $0x748] sm:$0xff]  ;;  %v248_v45 = vld [vmem:[%s4120_s0 + $0x758] sm:$0xff]  ;;  %v293_v5 = vld [vmem:[%s4120_s0 + $0x8c0] sm:$0xff] }
  0x66   :  { %1334 = vmatmul.mubr.bf16.gmra.mxu0 %v2247_v37  ;;  %1736 = vmatprep.subr.bf16.mxu1 %v572_v51  ;;  %v187_v37 = vld [vmem:[%s4120_s0 + $0x570] sm:$0xff]  ;;  %v418_v60 = vpack.c.bf16 %v248_v45, %v246_v44  ;;  %v2267_v35 = vld [vmem:[%s4121_s1 + $0x244] ss:$36 sps:$4 sm:$0xff]  }
  0x67   :  { %1487 = vmatmul.mubr.bf16.gmra.mxu1 %v2248_v42  ;;  %1343 = vmatprep.mubr.bf16.mxu0 %v2249_v43  ;;  %v182_v42 = vld [vmem:[%s4120_s0 + $0x548] sm:$0xff]  ;;  %v184_v43 = vld [vmem:[%s4120_s0 + $0x558] sm:$0xff]  ;;  %v387_v49 = vpack.c.bf16 %v187_v37, %v185_v33  ;;  %v183_v51 = vld [vmem:[%s4120_s0 + $0x550] sm:$0xff]  ;;  %v527_v37 = vmax.bf16 %v2397_v12, %v383_v21 }
  0x68   :  { %1496 = vmatprep.mubr.bf16.mxu1 %v2251_v50  ;;  %1584 = vmatpush2.bf16.msra.mxu0 %v539_v58  ;;  %v419_v50 = vpack.c.bf16 %v251_v39, %v249_v38  ;;  %v386_v57 = vpack.c.bf16 %v184_v43, %v182_v42  ;;  %v178_v58 = vld [vmem:[%s4120_s0 + $0x528] sm:$0xff]  ;;  %v385_v4 = vpack.c.bf16 %v183_v51, %v181_v46  ;;  %v295_v6 = vld [vmem:[%s4120_s0 + $0x8d0] sm:$0xff]  ;;  %v289_v16 = vld [vmem:[%s4120_s0 + $0x8a0] sm:$0xff] }
  0x69   :  { %1737 = vmatpush2.bf16.msra.mxu1 %v571_v59  ;;  %1585 = vmatprep.subr.bf16.mxu0 %v538_v62  ;;  %v564_v59 = vmax.bf16 %v2397_v12, %v420_v41  ;;  %v2261_v62 = vld [vmem:[%s4121_s1 + $0x1fc] ss:$36 sps:$4 sm:$0xff]   ;;  %v531_v2 = vmax.bf16 %v2397_v12, %v387_v49  ;;  %v562_v14 = vmax.bf16 %v2397_v12, %v418_v60  ;;  %v2273_v49 = vld [vmem:[%s4121_s1 + $0x28c] ss:$36 sps:$4 sm:$0xff]  }
  0x6a   :  { %1738 = vmatprep.subr.bf16.mxu1 %v570_v3  ;;  %v563_v3 = vmax.bf16 %v2397_v12, %v419_v50  ;;  %v530_v7 = vmax.bf16 %v2397_v12, %v386_v57  ;;  %v381_v39 = vpack.c.bf16 %v175_v24, %v173_v23  ;;  %v2275_v50 = vld [vmem:[%s4121_s1 + $0x294] ss:$36 sps:$4 sm:$0xff]   ;;  %v2277_v51 = vld [vmem:[%s4121_s1 + $0x288] ss:$36 sps:$4 sm:$0xff]   ;;  %v2285_v57 = vld [vmem:[%s4121_s1 + $0x31c] ss:$36 sps:$4 sm:$0xff]   ;;  %v441_v15 = vpack.c.bf16 %v295_v6, %v293_v5 }
  0x6b   :  { %v2290_v60 = vld [vmem:[%s4121_s1 + $0x320] ss:$36 sps:$4 sm:$0xff]   ;;  %v288_v21 = vld [vmem:[%s4120_s0 + $0x898] sm:$0xff] }
  0x6c   :  { %1586 = vmatpush2.bf16.msra.mxu0 %v537_v10  ;;  %v241_v10 = vld [vmem:[%s4120_s0 + $0x720] sm:$0xff]  ;;  %v525_v44 = vmax.bf16 %v2397_v12, %v381_v39  ;;  %v2301_v24 = vld [vmem:[%s4121_s1 + $0x58] ss:$36 sps:$4 sm:$0xff]  }
  0x6d   :  { %1739 = vmatpush2.bf16.msra.mxu1 %v569_v19  ;;  %1587 = vmatprep.subr.bf16.mxu0 %v536_v20  ;;  %v2265_v19 = vld [vmem:[%s4121_s1 + $0x1f8] ss:$36 sps:$4 sm:$0xff]   ;;  %v529_v20 = vmax.bf16 %v2397_v12, %v385_v4  ;;  %v415_v22 = vpack.c.bf16 %v243_v11, %v241_v10  ;;  %v2291_v4 = vld [vmem:[%s4121_s1 + $0x10] ss:$36 sps:$4 sm:$0xff]   ;;  %v285_v23 = vld [vmem:[%s4120_s0 + $0x880] sm:$0xff] }
  0x6e   :  { %1344 = vmatmul.mubr.bf16.gmra.mxu0 %v2253_v9  ;;  %1740 = vmatprep.subr.bf16.mxu1 %v568_v25  ;;  %v384_v9 = vpack.c.bf16 %v180_v61, %v178_v58  ;;  %v2266_v25 = vld [vmem:[%s4121_s1 + $0x200] ss:$36 sps:$4 sm:$0xff]   ;;  %v2293_v61 = vld [vmem:[%s4121_s1 + $0x14] ss:$36 sps:$4 sm:$0xff]  }
  0x6f   :  { %1497 = vmatmul.mubr.bf16.gmra.mxu1 %v2254_v17  ;;  %1353 = vmatprep.mubr.bf16.mxu0 %v2255_v18  ;;  %v238_v17 = vld [vmem:[%s4120_s0 + $0x708] sm:$0xff]  ;;  %v240_v18 = vld [vmem:[%s4120_s0 + $0x718] sm:$0xff]  ;;  %v559_v38 = vmax.bf16 %v2397_v12, %v415_v22  ;;  %v585_v22 = vmax.bf16 %v2397_v12, %v441_v15 }
  0x70   :  { %1506 = vmatprep.mubr.bf16.mxu1 %v2257_v29  ;;  %1588 = vmatpush2.bf16.msra.mxu0 %v535_v30  ;;  %v528_v27 = vmax.bf16 %v2397_v12, %v384_v9  ;;  %v237_v29 = vld [vmem:[%s4120_s0 + $0x700] sm:$0xff]  ;;  %v239_v30 = vld [vmem:[%s4120_s0 + $0x710] sm:$0xff]  ;;  %v414_v33 = vpack.c.bf16 %v240_v18, %v238_v17  ;;  %v292_v10 = vld [vmem:[%s4120_s0 + $0x8b8] sm:$0xff] }
  0x71   :  { %1741 = vmatpush2.bf16.msra.mxu1 %v567_v31  ;;  %1589 = vmatprep.subr.bf16.mxu0 %v534_v34  ;;  %v298_v31 = vld [vmem:[%s4120_s0 + $0x8e8] sm:$0xff]  ;;  %v300_v34 = vld [vmem:[%s4120_s0 + $0x8f8] sm:$0xff]  ;;  %v413_v41 = vpack.c.bf16 %v239_v30, %v237_v29  ;;  %v291_v18 = vld [vmem:[%s4120_s0 + $0x8b0] sm:$0xff] }
  0x72   :  { %1742 = vmatprep.subr.bf16.mxu1 %v566_v40  ;;  %v526_v40 = vmax.bf16 %v2397_v12, %v382_v28  ;;  %v444_v42 = vpack.c.bf16 %v300_v34, %v298_v31  ;;  %v558_v43 = vmax.bf16 %v2397_v12, %v414_v33  ;;  %v2287_v58 = vld [vmem:[%s4121_s1 + $0x324] ss:$36 sps:$4 sm:$0xff]   ;;  %v2297_v11 = vld [vmem:[%s4121_s1 + $0x5c] ss:$36 sps:$4 sm:$0xff]   ;;  %v2305_v33 = vld [vmem:[%s4121_s1 + $0xac] ss:$36 sps:$4 sm:$0xff]  }
  0x73   :  { %v557_v45 = vmax.bf16 %v2397_v12, %v413_v41  ;;  %v2302_v28 = vld [vmem:[%s4121_s1 + $0x60] ss:$36 sps:$4 sm:$0xff]   ;;  %v282_v31 = vld [vmem:[%s4120_s0 + $0x868] sm:$0xff] }
  0x74   :  { %1590 = vmatpush2.bf16.msra.mxu0 %v533_v48  ;;  %v588_v46 = vmax.bf16 %v2397_v12, %v444_v42  ;;  %v2272_v48 = vld [vmem:[%s4121_s1 + $0x248] ss:$36 sps:$4 sm:$0xff]  }
  0x75   :  { %1743 = vmatpush2.bf16.msra.mxu1 %v565_v55  ;;  %1591 = vmatprep.subr.bf16.mxu0 %v532_v56  ;;  %v2283_v55 = vld [vmem:[%s4121_s1 + $0x2d0] ss:$36 sps:$4 sm:$0xff]   ;;  %v2284_v56 = vld [vmem:[%s4121_s1 + $0x2d8] ss:$36 sps:$4 sm:$0xff]   ;;  %v2303_v29 = vld [vmem:[%s4121_s1 + $0xa4] ss:$36 sps:$4 sm:$0xff]  }
  0x76   :  { %1354 = vmatmul.mubr.bf16.gmra.mxu0 %v2259_v47  ;;  %1744 = vmatprep.subr.bf16.mxu1 %v564_v59  ;;  %v2271_v47 = vld [vmem:[%s4121_s1 + $0x240] ss:$36 sps:$4 sm:$0xff]   ;;  %v2289_v59 = vld [vmem:[%s4121_s1 + $0x318] ss:$36 sps:$4 sm:$0xff]  }
  0x77   :  { %1507 = vmatmul.mubr.bf16.gmra.mxu1 %v2260_v54  ;;  %1363 = vmatprep.mubr.bf16.mxu0 %v2261_v62  ;;  %v2281_v54 = vld [vmem:[%s4121_s1 + $0x2dc] ss:$36 sps:$4 sm:$0xff]  }
  0x78   :  { %1516 = vmatprep.mubr.bf16.mxu1 %v2263_v1  ;;  %1592 = vmatpush2.bf16.msra.mxu0 %v531_v2  ;;  %v2296_v62 = vld [vmem:[%s4121_s1 + $0x1c] ss:$36 sps:$4 sm:$0xff]   ;;  %v294_v1 = vld [vmem:[%s4120_s0 + $0x8c8] sm:$0xff] }
  0x79   :  { %1745 = vmatpush2.bf16.msra.mxu1 %v563_v3  ;;  %1593 = vmatprep.subr.bf16.mxu0 %v530_v7  ;;  %v296_v2 = vld [vmem:[%s4120_s0 + $0x8d8] sm:$0xff]  ;;  %v443_v3 = vpack.c.bf16 %v299_v0, %v297_v63  ;;  %v290_v7 = vld [vmem:[%s4120_s0 + $0x8a8] sm:$0xff] }
  0x7a   :  { %1746 = vmatprep.subr.bf16.mxu1 %v562_v14  ;;  %v442_v9 = vpack.c.bf16 %v296_v2, %v294_v1  ;;  %v2299_v14 = vld [vmem:[%s4121_s1 + $0x64] ss:$36 sps:$4 sm:$0xff]   ;;  %v440_v17 = vpack.c.bf16 %v292_v10, %v290_v7 }
  0x7b   :  { %v587_v13 = vmax.bf16 %v2397_v12, %v443_v3 }
  0x7c   :  { %1594 = vmatpush2.bf16.msra.mxu0 %v529_v20  ;;  %v286_v20 = vld [vmem:[%s4120_s0 + $0x888] sm:$0xff] }
  0x7d   :  { %1747 = vmatpush2.bf16.msra.mxu1 %v561_v26  ;;  %1595 = vmatprep.subr.bf16.mxu0 %v528_v27  ;;  %v439_v26 = vpack.c.bf16 %v291_v18, %v289_v16  ;;  %v287_v27 = vld [vmem:[%s4120_s0 + $0x890] sm:$0xff]  ;;  %v438_v30 = vpack.c.bf16 %v288_v21, %v286_v20 }
  0x7e   :  { %1364 = vmatmul.mubr.bf16.gmra.mxu0 %v2265_v19  ;;  %1748 = vmatprep.subr.bf16.mxu1 %v560_v32  ;;  %v586_v19 = vmax.bf16 %v2397_v12, %v442_v9  ;;  %v284_v32 = vld [vmem:[%s4120_s0 + $0x878] sm:$0xff] }
  0x7f   :  { %1517 = vmatmul.mubr.bf16.gmra.mxu1 %v2266_v25  ;;  %1373 = vmatprep.mubr.bf16.mxu0 %v2267_v35  ;;  %v584_v25 = vmax.bf16 %v2397_v12, %v440_v17  ;;  %v583_v34 = vmax.bf16 %v2397_v12, %v439_v26  ;;  %v437_v35 = vpack.c.bf16 %v287_v27, %v285_v23 }
  0x80   :  { %1526 = vmatprep.mubr.bf16.mxu1 %v2269_v36  ;;  %1596 = vmatpush2.bf16.msra.mxu0 %v527_v37 }
  0x81   :  { %1749 = vmatpush2.bf16.msra.mxu1 %v559_v38  ;;  %1597 = vmatprep.subr.bf16.mxu0 %v526_v40 }
  0x82   :  { %1750 = vmatprep.subr.bf16.mxu1 %v558_v43 }
  0x84   :  { %1598 = vmatpush2.bf16.msra.mxu0 %v525_v44 }
  0x85   :  { %1751 = vmatpush2.bf16.msra.mxu1 %v557_v45  ;;  %1873 = vmatprep.subr.bf16.mxu0 %v588_v46 }
  0x86   :  { %1374 = vmatmul.mubr.bf16.gmra.mxu0 %v2271_v47  ;;  %2199 = vmatprep.subr.bf16.mxu1 %v588_v46 }
  0x87   :  { %1527 = vmatmul.mubr.bf16.gmra.mxu1 %v2272_v48  ;;  %1383 = vmatprep.mubr.bf16.mxu0 %v2273_v49 }
  0x88   :  { %1536 = vmatprep.mubr.bf16.mxu1 %v2275_v50 }
  0x8e   :  { %1384 = vmatmul.mubr.bf16.gmra.mxu0 %v2277_v51 }
  0x8f   :  { %1537 = vmatmul.mubr.bf16.gmra.mxu1 %v2278_v52  ;;  %1393 = vmatprep.mubr.bf16.mxu0 %v2279_v53 }
  0x90   :  { %1546 = vmatprep.mubr.bf16.mxu1 %v2281_v54 }
  0x96   :  { %1394 = vmatmul.mubr.bf16.gmra.mxu0 %v2283_v55 }
  0x97   :  { %1547 = vmatmul.mubr.bf16.gmra.mxu1 %v2284_v56  ;;  %1403 = vmatprep.mubr.bf16.mxu0 %v2285_v57 }
  0x98   :  { %1556 = vmatprep.mubr.bf16.mxu1 %v2287_v58 }
  0x9e   :  { %1404 = vmatmul.mubr.bf16.gmra.mxu0 %v2289_v59 }
  0x9f   :  { %1557 = vmatmul.mubr.bf16.gmra.mxu1 %v2290_v60  ;;  %1599 = vmatprep.mubr.bf16.mxu0 %v2293_v61 }
  0xa0   :  { %1752 = vmatprep.mubr.bf16.mxu1 %v2296_v62 }
  0xa6   :  { %1600 = vmatmul.mubr.bf16.vlgmr.msra.gmra.mxu0 %v2291_v4 }
  0xa7   :  { %1753 = vmatmul.mubr.bf16.vlgmr.msra.gmra.mxu1 %v2294_v8  ;;  %1874 = vmatpush1.bf16.msra.mxu0 %v587_v13 }
  0xa8   :  { %2207 = vmatpush1.bf16.msra.mxu1 %v587_v13  ;;  %1609 = vmatprep.mubr.bf16.mxu0 %v2297_v11 }
  0xa9   :  { %1762 = vmatprep.mubr.bf16.mxu1 %v2299_v14  ;;  %1875 = vmatprep.subr.bf16.mxu0 %v586_v19 }
  0xaa   :  { %2200 = vmatprep.subr.bf16.mxu1 %v586_v19 }
  0xab   :  { %1876 = vmatpush1.bf16.msra.mxu0 %v585_v22 }
  0xac   :  { %2208 = vmatpush1.bf16.msra.mxu1 %v585_v22  ;;  %1877 = vmatprep.subr.bf16.mxu0 %v584_v25 }
  0xad   :  { %7 = vsyncpa [#allocation3], 0  ;;  %2201 = vmatprep.subr.bf16.mxu1 %v584_v25  ;;  %v582_v36 = vmax.bf16 %v2397_v12, %v438_v30  ;;  %v436_v37 = vpack.c.bf16 %v284_v32, %v282_v31  ;;  %v281_v38 = vld [vmem:[%s4120_s0 + $0x860] sm:$0xff]  ;;  %v283_v39 = vld [vmem:[%s4120_s0 + $0x870] sm:$0xff]  ;;  %v581_v42 = vmax.bf16 %v2397_v12, %v437_v35  ;;  %vm2027_vm0 = vcmask 556032  }
  0xae   :  { %1610 = vmatmul.mubr.bf16.gmra.mxu0 %v2301_v24  ;;  %v278_v40 = vld [vmem:[%s4120_s0 + $0x848] sm:$0xff]  ;;  %v280_v41 = vld [vmem:[%s4120_s0 + $0x858] sm:$0xff]  ;;  %v435_v43 = vpack.c.bf16 %v283_v39, %v281_v38  ;;  %v277_v46 = vld [vmem:[%s4120_s0 + $0x840] sm:$0xff] }
  0xaf   :  { %1763 = vmatmul.mubr.bf16.gmra.mxu1 %v2302_v28  ;;  %1619 = vmatprep.mubr.bf16.mxu0 %v2303_v29  ;;  %v580_v44 = vmax.bf16 %v2397_v12, %v436_v37  ;;  %v434_v45 = vpack.c.bf16 %v280_v41, %v278_v40  ;;  %v279_v47 = vld [vmem:[%s4120_s0 + $0x850] sm:$0xff]  ;;  %v2307_v48 = vld [vmem:[%s4121_s1 + $0xa0] ss:$36 sps:$4 sm:$0xff]   ;;  %v274_v49 = vld [vmem:[%s4120_s0 + $0x828] sm:$0xff] }
  0xb0   :  { %1772 = vmatprep.mubr.bf16.mxu1 %v2305_v33  ;;  %1878 = vmatpush1.bf16.msra.mxu0 %v583_v34  ;;  %v276_v50 = vld [vmem:[%s4120_s0 + $0x838] sm:$0xff]  ;;  %v2308_v51 = vld [vmem:[%s4121_s1 + $0xa8] ss:$36 sps:$4 sm:$0xff]   ;;  %v579_v54 = vmax.bf16 %v2397_v12, %v435_v43  ;;  %v433_v55 = vpack.c.bf16 %v279_v47, %v277_v46  ;;  %v273_v58 = vld [vmem:[%s4120_s0 + $0x820] sm:$0xff] }
  0xb1   :  { %2209 = vmatpush1.bf16.msra.mxu1 %v583_v34  ;;  %1879 = vmatprep.subr.bf16.mxu0 %v582_v36  ;;  %v2309_v52 = vld [vmem:[%s4121_s1 + $0xec] ss:$36 sps:$4 sm:$0xff]   ;;  %v2311_v53 = vld [vmem:[%s4121_s1 + $0xf4] ss:$36 sps:$4 sm:$0xff]   ;;  %v578_v56 = vmax.bf16 %v2397_v12, %v434_v45  ;;  %v432_v57 = vpack.c.bf16 %v276_v50, %v274_v49  ;;  %v269_v2 = vld [vmem:[%s4120_s0 + $0x800] sm:$0xff] }
  0xb2   :  { %2202 = vmatprep.subr.bf16.mxu1 %v582_v36  ;;  %v275_v59 = vld [vmem:[%s4120_s0 + $0x830] sm:$0xff]  ;;  %v270_v60 = vld [vmem:[%s4120_s0 + $0x808] sm:$0xff]  ;;  %v272_v61 = vld [vmem:[%s4120_s0 + $0x818] sm:$0xff]  ;;  %v577_v62 = vmax.bf16 %v2397_v12, %v433_v55 }
  0xb3   :  { %v431_v63 = vpack.c.bf16 %v275_v59, %v273_v58  ;;  %v576_v0 = vmax.bf16 %v2397_v12, %v432_v57  ;;  %v430_v1 = vpack.c.bf16 %v272_v61, %v270_v60  ;;  %v271_v3 = vld [vmem:[%s4120_s0 + $0x810] sm:$0xff]  ;;  %v2313_v4 = vld [vmem:[%s4121_s1 + $0xe8] ss:$36 sps:$4 sm:$0xff]   ;;  %v2317_v7 = vld [vmem:[%s4121_s1 + $0x13c] ss:$36 sps:$4 sm:$0xff]  }
  0xb4   :  { %1880 = vmatpush1.bf16.msra.mxu0 %v581_v42  ;;  %v2314_v5 = vld [vmem:[%s4121_s1 + $0xf0] ss:$36 sps:$4 sm:$0xff]   ;;  %v429_v9 = vpack.c.bf16 %v271_v3, %v269_v2  ;;  %v2320_v14 = vld [vmem:[%s4121_s1 + $0x138] ss:$36 sps:$4 sm:$0xff]   ;;  %v2323_v16 = vld [vmem:[%s4121_s1 + $0x184] ss:$36 sps:$4 sm:$0xff]  }
  0xb5   :  { %2210 = vmatpush1.bf16.msra.mxu1 %v581_v42  ;;  %1881 = vmatprep.subr.bf16.mxu0 %v580_v44  ;;  %v2315_v6 = vld [vmem:[%s4121_s1 + $0x134] ss:$36 sps:$4 sm:$0xff]   ;;  %v575_v8 = vmax.bf16 %v2397_v12, %v431_v63  ;;  %v574_v10 = vmax.bf16 %v2397_v12, %v430_v1  ;;  %v2321_v15 = vld [vmem:[%s4121_s1 + $0x17c] ss:$36 sps:$4 sm:$0xff]   ;;  %v2327_v19 = vld [vmem:[%s4121_s1 + $0x1c4] ss:$36 sps:$4 sm:$0xff]  }
  0xb6   :  { %1620 = vmatmul.mubr.bf16.gmra.mxu0 %v2307_v48  ;;  %2203 = vmatprep.subr.bf16.mxu1 %v580_v44  ;;  %v573_v11 = vmax.bf16 %v2397_v12, %v429_v9  ;;  %v2319_v13 = vld [vmem:[%s4121_s1 + $0x130] ss:$36 sps:$4 sm:$0xff]   ;;  %v2325_v17 = vld [vmem:[%s4121_s1 + $0x178] ss:$36 sps:$4 sm:$0xff]   ;;  %v2326_v18 = vld [vmem:[%s4121_s1 + $0x180] ss:$36 sps:$4 sm:$0xff]  }
  0xb7   :  { %1773 = vmatmul.mubr.bf16.gmra.mxu1 %v2308_v51  ;;  %1629 = vmatprep.mubr.bf16.mxu0 %v2309_v52  ;;  %v2329_v20 = vld [vmem:[%s4121_s1 + $0x1cc] ss:$36 sps:$4 sm:$0xff]   ;;  %v2331_v21 = vld [vmem:[%s4121_s1 + $0x1c0] ss:$36 sps:$4 sm:$0xff]   ;;  %v2335_v24 = vld [vmem:[%s4121_s1 + $0x214] ss:$36 sps:$4 sm:$0xff]  }
  0xb8   :  { %1782 = vmatprep.mubr.bf16.mxu1 %v2311_v53  ;;  %1882 = vmatpush1.bf16.msra.mxu0 %v579_v54  ;;  %v2332_v22 = vld [vmem:[%s4121_s1 + $0x1c8] ss:$36 sps:$4 sm:$0xff]   ;;  %v2338_v26 = vld [vmem:[%s4121_s1 + $0x210] ss:$36 sps:$4 sm:$0xff]   ;;  %v2341_v28 = vld [vmem:[%s4121_s1 + $0x25c] ss:$36 sps:$4 sm:$0xff]  }
  0xb9   :  { %2211 = vmatpush1.bf16.msra.mxu1 %v579_v54  ;;  %1883 = vmatprep.subr.bf16.mxu0 %v578_v56  ;;  %v2333_v23 = vld [vmem:[%s4121_s1 + $0x20c] ss:$36 sps:$4 sm:$0xff]   ;;  %v2339_v27 = vld [vmem:[%s4121_s1 + $0x254] ss:$36 sps:$4 sm:$0xff]   ;;  %v2345_v31 = vld [vmem:[%s4121_s1 + $0x29c] ss:$36 sps:$4 sm:$0xff]  }
  0xba   :  { %2204 = vmatprep.subr.bf16.mxu1 %v578_v56  ;;  %v2337_v25 = vld [vmem:[%s4121_s1 + $0x208] ss:$36 sps:$4 sm:$0xff]   ;;  %v2343_v29 = vld [vmem:[%s4121_s1 + $0x250] ss:$36 sps:$4 sm:$0xff]   ;;  %v2344_v30 = vld [vmem:[%s4121_s1 + $0x258] ss:$36 sps:$4 sm:$0xff]  }
  0xbb   :  { %v2347_v32 = vld [vmem:[%s4121_s1 + $0x2a4] ss:$36 sps:$4 sm:$0xff]   ;;  %v2349_v33 = vld [vmem:[%s4121_s1 + $0x298] ss:$36 sps:$4 sm:$0xff]   ;;  %v2353_v36 = vld [vmem:[%s4121_s1 + $0x2ec] ss:$36 sps:$4 sm:$0xff]  }
  0xbc   :  { %1884 = vmatpush1.bf16.msra.mxu0 %v577_v62  ;;  %v2350_v34 = vld [vmem:[%s4121_s1 + $0x2a0] ss:$36 sps:$4 sm:$0xff]   ;;  %v2356_v38 = vld [vmem:[%s4121_s1 + $0x2e8] ss:$36 sps:$4 sm:$0xff]   ;;  %v2359_v40 = vld [vmem:[%s4121_s1 + $0x334] ss:$36 sps:$4 sm:$0xff]  }
  0xbd   :  { %2212 = vmatpush1.bf16.msra.mxu1 %v577_v62  ;;  %1885 = vmatprep.subr.bf16.mxu0 %v576_v0  ;;  %v2351_v35 = vld [vmem:[%s4121_s1 + $0x2e4] ss:$36 sps:$4 sm:$0xff]   ;;  %v2357_v39 = vld [vmem:[%s4121_s1 + $0x32c] ss:$36 sps:$4 sm:$0xff]   ;;  %v2366_v54 = vld [vmem:[%s4121_s1 + $0x218] ss:$36 sps:$4 sm:$0xff]  }
  0xbe   :  { %1630 = vmatmul.mubr.bf16.gmra.mxu0 %v2313_v4  ;;  %2205 = vmatprep.subr.bf16.mxu1 %v576_v0  ;;  %v2355_v37 = vld [vmem:[%s4121_s1 + $0x2e0] ss:$36 sps:$4 sm:$0xff]   ;;  %v2361_v41 = vld [vmem:[%s4121_s1 + $0x328] ss:$36 sps:$4 sm:$0xff]   ;;  %v2362_v42 = vld [vmem:[%s4121_s1 + $0x330] ss:$36 sps:$4 sm:$0xff]  }
  0xbf   :  { %1783 = vmatmul.mubr.bf16.gmra.mxu1 %v2314_v5  ;;  %1639 = vmatprep.mubr.bf16.mxu0 %v2315_v6  ;;  %v2363_v43 = vld [vmem:[%s4121_s1 + $0x20] ss:$36 sps:$4 sm:$0xff]   ;;  %v2364_v44 = vld [vmem:[%s4121_s1 + $0x1d0] ss:$36 sps:$4 sm:$0xff]   ;;  %v2365_v52 = vld [vmem:[%s4121_s1 + $0x68] ss:$36 sps:$4 sm:$0xff]  }
  0xc0   :  { %1792 = vmatprep.mubr.bf16.mxu1 %v2317_v7  ;;  %1886 = vmatpush1.bf16.msra.mxu0 %v575_v8  ;;  %v2367_v2 = vld [vmem:[%s4121_s1 + $0xb0] ss:$36 sps:$4 sm:$0xff]   ;;  %v2368_v4 = vld [vmem:[%s4121_s1 + $0x260] ss:$36 sps:$4 sm:$0xff]  }
  0xc1   :  { %2213 = vmatpush1.bf16.msra.mxu1 %v575_v8  ;;  %1887 = vmatprep.subr.bf16.mxu0 %v574_v10 }
  0xc2   :  { %2206 = vmatprep.subr.bf16.mxu1 %v574_v10 }
  0xc4   :  { %1888 = vmatpush1.bf16.msra.mxu0 %v573_v11 }
  0xc5   :  { %2214 = vmatpush1.bf16.msra.mxu1 %v573_v11 }
  0xc6   :  { %1640 = vmatmul.mubr.bf16.gmra.mxu0 %v2319_v13 }
  0xc7   :  { %1793 = vmatmul.mubr.bf16.gmra.mxu1 %v2320_v14  ;;  %1649 = vmatprep.mubr.bf16.mxu0 %v2321_v15 }
  0xc8   :  { %1802 = vmatprep.mubr.bf16.mxu1 %v2323_v16 }
  0xce   :  { %1650 = vmatmul.mubr.bf16.gmra.mxu0 %v2325_v17  ;;  %v2369_v17 = vld [vmem:[%s4121_s1 + $0xf8] ss:$36 sps:$4 sm:$0xff]  }
  0xcf   :  { %1803 = vmatmul.mubr.bf16.gmra.mxu1 %v2326_v18  ;;  %1659 = vmatprep.mubr.bf16.mxu0 %v2327_v19  ;;  %v2370_v19 = vld [vmem:[%s4121_s1 + $0x2a8] ss:$36 sps:$4 sm:$0xff]  }
  0xd0   :  { %1812 = vmatprep.mubr.bf16.mxu1 %v2329_v20 }
  0xd6   :  { %1660 = vmatmul.mubr.bf16.gmra.mxu0 %v2331_v21 }
  0xd7   :  { %1813 = vmatmul.mubr.bf16.gmra.mxu1 %v2332_v22  ;;  %1669 = vmatprep.mubr.bf16.mxu0 %v2333_v23 }
  0xd8   :  { %1822 = vmatprep.mubr.bf16.mxu1 %v2335_v24 }
  0xde   :  { %1670 = vmatmul.mubr.bf16.gmra.mxu0 %v2337_v25 }
  0xdf   :  { %1823 = vmatmul.mubr.bf16.gmra.mxu1 %v2338_v26  ;;  %1679 = vmatprep.mubr.bf16.mxu0 %v2339_v27 }
  0xe0   :  { %1832 = vmatprep.mubr.bf16.mxu1 %v2341_v28 }
  0xe6   :  { %1680 = vmatmul.mubr.bf16.gmra.mxu0 %v2343_v29 }
  0xe7   :  { %1833 = vmatmul.mubr.bf16.gmra.mxu1 %v2344_v30  ;;  %1689 = vmatprep.mubr.bf16.mxu0 %v2345_v31  ;;  %v2371_v31 = vld [vmem:[%s4121_s1 + $0x140] ss:$36 sps:$4 sm:$0xff]  }
  0xe8   :  { %1842 = vmatprep.mubr.bf16.mxu1 %v2347_v32 }
  0xee   :  { %1690 = vmatmul.mubr.bf16.gmra.mxu0 %v2349_v33  ;;  %v2372_v33 = vld [vmem:[%s4121_s1 + $0x2f0] ss:$36 sps:$4 sm:$0xff]  }
  0xef   :  { %1843 = vmatmul.mubr.bf16.gmra.mxu1 %v2350_v34  ;;  %1699 = vmatprep.mubr.bf16.mxu0 %v2351_v35 }
  0xf0   :  { %1852 = vmatprep.mubr.bf16.mxu1 %v2353_v36 }
  0xf6   :  { %1700 = vmatmul.mubr.bf16.gmra.mxu0 %v2355_v37 }
  0xf7   :  { %1853 = vmatmul.mubr.bf16.gmra.mxu1 %v2356_v38  ;;  %1709 = vmatprep.mubr.bf16.mxu0 %v2357_v39 }
  0xf8   :  { %1862 = vmatprep.mubr.bf16.mxu1 %v2359_v40 }
  0xfe   :  { %1710 = vmatmul.mubr.bf16.gmra.mxu0 %v2361_v41 }
  0xff   :  { %1863 = vmatmul.mubr.bf16.gmra.mxu1 %v2362_v42  ;;  %1905 = vmatprep.mubr.bf16.mxu0 %v2397_v12 }
 0x100   :  { %1965 = vmatprep.mubr.bf16.mxu1 %v2397_v12 }
 0x106   :  { %v1295_v45 = vpop.f32.mrf.mxu0  ;;  %1906 = vmatmul.mubr.bf16.vlgmr.msra.gmra.mxu0 %v2363_v43 }
 0x107   :  { %v1448_v46 = vpop.f32.mrf.mxu1  ;;  %1966 = vmatmul.mubr.bf16.vlgmr.msra.gmra.mxu1 %v2364_v44  ;;  %1915 = vmatprep.mubr.bf16.mxu0 %v2397_v12 }
 0x108   :  { %v3721_v47 = vadd.f32 %v1448_v46, %v1295_v45  ;;  %v1297_v48 = vpop.f32.mrf.mxu0  ;;  %1975 = vmatprep.mubr.bf16.mxu1 %v2397_v12  ;;  %v2373_v45 = vld [vmem:[%s4121_s1 + $0x188] ss:$36 sps:$4 sm:$0xff]  }
 0x109   :  { %v1450_v49 = vpop.f32.mrf.mxu1 }
 0x10a   :  { %v3724_v50 = vadd.f32 %v1450_v49, %v1297_v48  ;;  %v1299_v51 = vpop.f32.mrf.mxu0  ;;  %v2374_v48 = vld [vmem:[%s4121_s1 + $0x338] ss:$36 sps:$4 sm:$0xff]   ;;  %s2398_s1 = smov [#allocation2]  }
 0x10b   :  { %v1452_v53 = vpop.f32.mrf.mxu1  ;;  %s2080_s14 = sshll.u32 %s2398_s1, 4  ;;  %s2081_s14 = int_to_ptr.vmem [resolvable:$true] %s2080_s14 }
 0x10c   :  { %v3732_v55 = vadd.f32 %v1452_v53, %v1299_v51  ;;  %v1301_v56 = vpop.f32.mrf.mxu0  ;;  %s2375_s15 = scalar_lea.vmem %s2081_s14, 6144  ;;  %p2380_p1 = scmp.lt.s32.totalorder %s2081_s14, %s2081_s14 }
 0x10d   :  { %v1454_v57 = vpop.f32.mrf.mxu1  ;;  %p2376_p0 = scmp.ne.s32.totalorder %s2081_s14, %s2375_s15  ;;  %p2381_p2 = scmp.lt.s32.totalorder %s2375_s15, %s2375_s15 }
 0x10e   :  { %v3734_v58 = vadd.f32 %v1454_v57, %v1301_v56  ;;  %v1305_v59 = vpop.f32.mrf.mxu0  ;;  %1916 = vmatmul.mubr.bf16.gmra.mxu0 %v2365_v52 }
 0x10f   :  { %v1458_v60 = vpop.f32.mrf.mxu1  ;;  %1976 = vmatmul.mubr.bf16.gmra.mxu1 %v2366_v54  ;;  %1925 = vmatprep.mubr.bf16.mxu0 %v2397_v12  ;;  %p2382_p3 = por %p2381_p2, %p2380_p1 }
 0x110   :  { %v3737_v61 = vadd.f32 %v1458_v60, %v1305_v59  ;;  %v1307_v62 = vpop.f32.mrf.mxu0  ;;  %1985 = vmatprep.mubr.bf16.mxu1 %v2397_v12 }
 0x111   :  { %v1460_v63 = vpop.f32.mrf.mxu1  ;;  %p2383_p4 = pnand %p2382_p3, %p2376_p0 }
 0x112   :  { %v3740_v0 = vadd.f32 %v1460_v63, %v1307_v62  ;;  %v1309_v1 = vpop.f32.mrf.mxu0 }
 0x113   :  { %v1462_v3 = vpop.f32.mrf.mxu1 }
 0x114   :  { %v3748_v5 = vadd.f32 %v1462_v3, %v1309_v1  ;;  %v1311_v6 = vpop.f32.mrf.mxu0 }
 0x115   :  { %v1464_v7 = vpop.f32.mrf.mxu1 }
 0x116   :  { %v3750_v8 = vadd.f32 %v1464_v7, %v1311_v6  ;;  %v1315_v9 = vpop.f32.mrf.mxu0  ;;  %1926 = vmatmul.mubr.bf16.gmra.mxu0 %v2367_v2 }
 0x117   :  { %v1468_v10 = vpop.f32.mrf.mxu1  ;;  %1986 = vmatmul.mubr.bf16.gmra.mxu1 %v2368_v4  ;;  %1935 = vmatprep.mubr.bf16.mxu0 %v2397_v12 }
 0x118   :  { %v3753_v11 = vadd.f32 %v1468_v10, %v1315_v9  ;;  %v1317_v13 = vpop.f32.mrf.mxu0  ;;  %1995 = vmatprep.mubr.bf16.mxu1 %v2397_v12 }
 0x119   :  { %v1470_v14 = vpop.f32.mrf.mxu1 }
 0x11a   :  { %v3756_v15 = vadd.f32 %v1470_v14, %v1317_v13  ;;  %v1319_v16 = vpop.f32.mrf.mxu0 }
 0x11b   :  { %v1472_v18 = vpop.f32.mrf.mxu1 }
 0x11c   :  { %v3764_v20 = vadd.f32 %v1472_v18, %v1319_v16  ;;  %v1321_v21 = vpop.f32.mrf.mxu0 }
 0x11d   :  { %v1474_v22 = vpop.f32.mrf.mxu1 }
 0x11e   :  { %v3766_v23 = vadd.f32 %v1474_v22, %v1321_v21  ;;  %v1325_v24 = vpop.f32.mrf.mxu0  ;;  %1936 = vmatmul.mubr.bf16.gmra.mxu0 %v2369_v17 }
 0x11f   :  { %v1478_v25 = vpop.f32.mrf.mxu1  ;;  %1996 = vmatmul.mubr.bf16.gmra.mxu1 %v2370_v19  ;;  %1945 = vmatprep.mubr.bf16.mxu0 %v2397_v12 }
 0x120   :  { %v3769_v26 = vadd.f32 %v1478_v25, %v1325_v24  ;;  %v1327_v27 = vpop.f32.mrf.mxu0  ;;  %2005 = vmatprep.mubr.bf16.mxu1 %v2397_v12 }
 0x121   :  { %v1480_v28 = vpop.f32.mrf.mxu1 }
 0x122   :  { %v3772_v29 = vadd.f32 %v1480_v28, %v1327_v27  ;;  %v1329_v30 = vpop.f32.mrf.mxu0 }
 0x123   :  { %v1482_v32 = vpop.f32.mrf.mxu1 }
 0x124   :  { %v3780_v34 = vadd.f32 %v1482_v32, %v1329_v30  ;;  %v1331_v35 = vpop.f32.mrf.mxu0 }
 0x125   :  { %v1484_v36 = vpop.f32.mrf.mxu1 }
 0x126   :  { %v3782_v37 = vadd.f32 %v1484_v36, %v1331_v35  ;;  %v1335_v38 = vpop.f32.mrf.mxu0  ;;  %1946 = vmatmul.mubr.bf16.gmra.mxu0 %v2371_v31 }
 0x127   :  { %v1488_v39 = vpop.f32.mrf.mxu1  ;;  %2006 = vmatmul.mubr.bf16.gmra.mxu1 %v2372_v33  ;;  %1955 = vmatprep.mubr.bf16.mxu0 %v2397_v12 }
 0x128   :  { %v3785_v40 = vadd.f32 %v1488_v39, %v1335_v38  ;;  %v1337_v41 = vpop.f32.mrf.mxu0  ;;  %2015 = vmatprep.mubr.bf16.mxu1 %v2397_v12 }
 0x129   :  { %v1490_v42 = vpop.f32.mrf.mxu1 }
 0x12a   :  { %v3788_v43 = vadd.f32 %v1490_v42, %v1337_v41  ;;  %v1339_v44 = vpop.f32.mrf.mxu0 }
 0x12b   :  { %v1492_v46 = vpop.f32.mrf.mxu1 }
 0x12c   :  { %v3796_v49 = vadd.f32 %v1492_v46, %v1339_v44  ;;  %v1341_v51 = vpop.f32.mrf.mxu0 }
 0x12d   :  { %v1494_v52 = vpop.f32.mrf.mxu1 }
 0x12e   :  { %v3798_v53 = vadd.f32 %v1494_v52, %v1341_v51  ;;  %v1345_v12 = vpop.f32.mrf.mxu0  ;;  %1956 = vmatmul.mubr.bf16.gmra.mxu0 %v2373_v45 }
 0x12f   :  { %v1498_v54 = vpop.f32.mrf.mxu1  ;;  %2016 = vmatmul.mubr.bf16.gmra.mxu1 %v2374_v48 }
 0x130   :  { %v3800_v56 = vadd.f32 %v1498_v54, %v1345_v12  ;;  %v1347_v57 = vpop.f32.mrf.mxu0 }
 0x131   :  { %v1500_v59 = vpop.f32.mrf.mxu1 }
 0x132   :  { %v3802_v60 = vadd.f32 %v1500_v59, %v1347_v57  ;;  %v1349_v62 = vpop.f32.mrf.mxu0 }
 0x133   :  { %v1502_v63 = vpop.f32.mrf.mxu1 }
 0x134   :  { %v3804_v1 = vadd.f32 %v1502_v63, %v1349_v62  ;;  %v1351_v2 = vpop.f32.mrf.mxu0 }
 0x135   :  { %v1504_v3 = vpop.f32.mrf.mxu1 }
 0x136   :  { %v3806_v4 = vadd.f32 %v1504_v3, %v1351_v2  ;;  %v1355_v6 = vpop.f32.mrf.mxu0 }
 0x137   :  { %v1508_v7 = vpop.f32.mrf.mxu1 }
 0x138   :  { %v3808_v9 = vadd.f32 %v1508_v7, %v1355_v6  ;;  %v1357_v10 = vpop.f32.mrf.mxu0 }
 0x139   :  { %v1510_v13 = vpop.f32.mrf.mxu1 }
 0x13a   :  { %v3810_v14 = vadd.f32 %v1510_v13, %v1357_v10  ;;  %v1359_v16 = vpop.f32.mrf.mxu0 }
 0x13b   :  { %v1512_v17 = vpop.f32.mrf.mxu1 }
 0x13c   :  { %v3812_v18 = vadd.f32 %v1512_v17, %v1359_v16  ;;  %v1361_v19 = vpop.f32.mrf.mxu0 }
 0x13d   :  { %v1514_v21 = vpop.f32.mrf.mxu1 }
 0x13e   :  { %v3814_v22 = vadd.f32 %v1514_v21, %v1361_v19  ;;  %v1365_v24 = vpop.f32.mrf.mxu0 }
 0x13f   :  { %v1518_v25 = vpop.f32.mrf.mxu1 }
 0x140   :  { %v3816_v27 = vadd.f32 %v1518_v25, %v1365_v24  ;;  %v1367_v28 = vpop.f32.mrf.mxu0 }
 0x141   :  { %v1520_v30 = vpop.f32.mrf.mxu1 }
 0x142   :  { %v3818_v31 = vadd.f32 %v1520_v30, %v1367_v28  ;;  %v1369_v32 = vpop.f32.mrf.mxu0 }
 0x143   :  { %v1522_v33 = vpop.f32.mrf.mxu1 }
 0x144   :  { %v3820_v35 = vadd.f32 %v1522_v33, %v1369_v32  ;;  %v1371_v36 = vpop.f32.mrf.mxu0 }
 0x145   :  { %v1524_v38 = vpop.f32.mrf.mxu1 }
 0x146   :  { %v3822_v39 = vadd.f32 %v1524_v38, %v1371_v36  ;;  %v1375_v41 = vpop.f32.mrf.mxu0 }
 0x147   :  { %v1528_v42 = vpop.f32.mrf.mxu1 }
 0x148   :  { %v3824_v44 = vadd.f32 %v1528_v42, %v1375_v41  ;;  %v1377_v45 = vpop.f32.mrf.mxu0 }
 0x149   :  { %v1530_v46 = vpop.f32.mrf.mxu1 }
 0x14a   :  { %v3826_v48 = vadd.f32 %v1530_v46, %v1377_v45  ;;  %v1379_v51 = vpop.f32.mrf.mxu0 }
 0x14b   :  { %v1532_v52 = vpop.f32.mrf.mxu1 }
 0x14c   :  { %v3828_v12 = vadd.f32 %v1532_v52, %v1379_v51  ;;  %v1381_v54 = vpop.f32.mrf.mxu0 }
 0x14d   :  { %v1534_v57 = vpop.f32.mrf.mxu1 }
 0x14e   :  { %v3830_v59 = vadd.f32 %v1534_v57, %v1381_v54  ;;  %v1385_v62 = vpop.f32.mrf.mxu0 }
 0x14f   :  { %v1538_v63 = vpop.f32.mrf.mxu1 }
 0x150   :  { %v3832_v2 = vadd.f32 %v1538_v63, %v1385_v62  ;;  %v1387_v3 = vpop.f32.mrf.mxu0 }
 0x151   :  { %v1540_v6 = vpop.f32.mrf.mxu1 }
 0x152   :  { %v3834_v7 = vadd.f32 %v1540_v6, %v1387_v3  ;;  %v1389_v10 = vpop.f32.mrf.mxu0 }
 0x153   :  { %v1542_v13 = vpop.f32.mrf.mxu1 }
 0x154   :  { %v3836_v16 = vadd.f32 %v1542_v13, %v1389_v10  ;;  %v1391_v17 = vpop.f32.mrf.mxu0 }
 0x155   :  { %v1544_v19 = vpop.f32.mrf.mxu1 }
 0x156   :  { %4123 = vst [vmem:[#allocation5_spill] sm:$0xff] %v3836_v16  ;;  %v3838_v21 = vadd.f32 %v1544_v19, %v1391_v17  ;;  %v1395_v24 = vpop.f32.mrf.mxu0 }
 0x157   :  { %v1548_v25 = vpop.f32.mrf.mxu1 }
 0x158   :  { %4124 = vst [vmem:[#allocation6_spill] sm:$0xff] %v3838_v21  ;;  %v3840_v28 = vadd.f32 %v1548_v25, %v1395_v24  ;;  %v1397_v30 = vpop.f32.mrf.mxu0 }
 0x159   :  { %v1550_v32 = vpop.f32.mrf.mxu1 }
 0x15a   :  { %4125 = vst [vmem:[#allocation7_spill] sm:$0xff] %v3840_v28  ;;  %v3842_v33 = vadd.f32 %v1550_v32, %v1397_v30  ;;  %v1399_v36 = vpop.f32.mrf.mxu0 }
 0x15b   :  { %v1552_v38 = vpop.f32.mrf.mxu1 }
 0x15c   :  { %4126 = vst [vmem:[#allocation8_spill] sm:$0xff] %v3842_v33  ;;  %v3844_v41 = vadd.f32 %v1552_v38, %v1399_v36  ;;  %v1401_v42 = vpop.f32.mrf.mxu0 }
 0x15d   :  { %v1554_v45 = vpop.f32.mrf.mxu1 }
 0x15e   :  { %4127 = vst [vmem:[#allocation9_spill] sm:$0xff] %v3844_v41  ;;  %v3846_v46 = vadd.f32 %v1554_v45, %v1401_v42  ;;  %v1405_v51 = vpop.f32.mrf.mxu0 }
 0x15f   :  { %v1558_v52 = vpop.f32.mrf.mxu1 }
 0x160   :  { %4128 = vst [vmem:[#allocation10_spill] sm:$0xff] %v3846_v46  ;;  %v3848_v54 = vadd.f32 %v1558_v52, %v1405_v51  ;;  %v1407_v57 = vpop.f32.mrf.mxu0 }
 0x161   :  { %v1560_v62 = vpop.f32.mrf.mxu1 }
 0x162   :  { %4129 = vst [vmem:[#allocation11_spill] sm:$0xff] %v3848_v54  ;;  %v3850_v63 = vadd.f32 %v1560_v62, %v1407_v57  ;;  %v1409_v3 = vpop.f32.mrf.mxu0 }
 0x163   :  { %v1562_v6 = vpop.f32.mrf.mxu1 }
 0x164   :  { %4130 = vst [vmem:[#allocation12_spill] sm:$0xff] %v3850_v63  ;;  %v3852_v10 = vadd.f32 %v1562_v6, %v1409_v3  ;;  %v1411_v13 = vpop.f32.mrf.mxu0 }
 0x165   :  { %v1564_v17 = vpop.f32.mrf.mxu1 }
 0x166   :  { %4131 = vst [vmem:[#allocation13_spill] sm:$0xff] %v3852_v10  ;;  %v3854_v19 = vadd.f32 %v1564_v17, %v1411_v13  ;;  %v1601_v24 = vpop.f32.mrf.mxu0 }
 0x167   :  { %v1602_v25 = vadd.f32 %v1601_v24, %v3721_v47  ;;  %v1754_v30 = vpop.f32.mrf.mxu1 }
 0x168   :  { %4132 = vst [vmem:[#allocation14_spill] sm:$0xff] %v3854_v19  ;;  %v1603_v32 = vpop.f32.mrf.mxu0 }
 0x169   :  { %v3857_v36 = vadd.f32 %v1754_v30, %v1602_v25  ;;  %v1604_v38 = vadd.f32 %v1603_v32, %v3724_v50  ;;  %v1756_v42 = vpop.f32.mrf.mxu1 }
 0x16a   :  { %v1605_v45 = vpop.f32.mrf.mxu0 }
 0x16b   :  { %v3860_v51 = vadd.f32 %v1756_v42, %v1604_v38  ;;  %v1606_v52 = vadd.f32 %v1605_v45, %v3732_v55  ;;  %v1758_v57 = vpop.f32.mrf.mxu1 }
 0x16c   :  { %v1607_v62 = vpop.f32.mrf.mxu0 }
 0x16d   :  { %v3863_v3 = vadd.f32 %v1758_v57, %v1606_v52  ;;  %v1608_v6 = vadd.f32 %v1607_v62, %v3734_v58  ;;  %v1760_v13 = vpop.f32.mrf.mxu1 }
 0x16e   :  { %v1611_v47 = vpop.f32.mrf.mxu0 }
 0x16f   :  { %v3866_v17 = vadd.f32 %v1760_v13, %v1608_v6  ;;  %v1612_v24 = vadd.f32 %v1611_v47, %v3737_v61  ;;  %v1764_v25 = vpop.f32.mrf.mxu1 }
 0x170   :  { %v1613_v50 = vpop.f32.mrf.mxu0 }
 0x171   :  { %v3869_v30 = vadd.f32 %v1764_v25, %v1612_v24  ;;  %v1614_v32 = vadd.f32 %v1613_v50, %v3740_v0  ;;  %v1766_v38 = vpop.f32.mrf.mxu1 }
 0x172   :  { %v1615_v55 = vpop.f32.mrf.mxu0 }
 0x173   :  { %v3872_v42 = vadd.f32 %v1766_v38, %v1614_v32  ;;  %v1616_v45 = vadd.f32 %v1615_v55, %v3748_v5  ;;  %v1768_v52 = vpop.f32.mrf.mxu1 }
 0x174   :  { %v1617_v58 = vpop.f32.mrf.mxu0 }
 0x175   :  { %v3875_v57 = vadd.f32 %v1768_v52, %v1616_v45  ;;  %v1618_v62 = vadd.f32 %v1617_v58, %v3750_v8  ;;  %v1770_v6 = vpop.f32.mrf.mxu1 }
 0x176   :  { %v1621_v61 = vpop.f32.mrf.mxu0 }
 0x177   :  { %v3878_v13 = vadd.f32 %v1770_v6, %v1618_v62  ;;  %v1622_v47 = vadd.f32 %v1621_v61, %v3753_v11  ;;  %v1774_v24 = vpop.f32.mrf.mxu1 }
 0x178   :  { %v1623_v0 = vpop.f32.mrf.mxu0 }
 0x179   :  { %v3881_v25 = vadd.f32 %v1774_v24, %v1622_v47  ;;  %v1624_v50 = vadd.f32 %v1623_v0, %v3756_v15  ;;  %v1776_v32 = vpop.f32.mrf.mxu1 }
 0x17a   :  { %v1625_v5 = vpop.f32.mrf.mxu0 }
 0x17b   :  { %v3884_v38 = vadd.f32 %v1776_v32, %v1624_v50  ;;  %v1626_v55 = vadd.f32 %v1625_v5, %v3764_v20  ;;  %v1778_v45 = vpop.f32.mrf.mxu1 }
 0x17c   :  { %v1627_v8 = vpop.f32.mrf.mxu0 }
 0x17d   :  { %v3887_v52 = vadd.f32 %v1778_v45, %v1626_v55  ;;  %v1628_v58 = vadd.f32 %v1627_v8, %v3766_v23  ;;  %v1780_v62 = vpop.f32.mrf.mxu1 }
 0x17e   :  { %v1631_v11 = vpop.f32.mrf.mxu0 }
 0x17f   :  { %v3890_v6 = vadd.f32 %v1780_v62, %v1628_v58  ;;  %v1632_v61 = vadd.f32 %v1631_v11, %v3769_v26  ;;  %v1784_v47 = vpop.f32.mrf.mxu1 }
 0x180   :  { %v1633_v15 = vpop.f32.mrf.mxu0 }
 0x181   :  { %v3893_v24 = vadd.f32 %v1784_v47, %v1632_v61  ;;  %v1634_v0 = vadd.f32 %v1633_v15, %v3772_v29  ;;  %v1786_v50 = vpop.f32.mrf.mxu1 }
 0x182   :  { %v1635_v20 = vpop.f32.mrf.mxu0 }
 0x183   :  { %4133 = vst [vmem:[#allocation15_spill] sm:$0xff] %v3893_v24  ;;  %v3896_v32 = vadd.f32 %v1786_v50, %v1634_v0  ;;  %v1636_v5 = vadd.f32 %v1635_v20, %v3780_v34  ;;  %v1788_v55 = vpop.f32.mrf.mxu1 }
 0x184   :  { %v1637_v23 = vpop.f32.mrf.mxu0 }
 0x185   :  { %4134 = vst [vmem:[#allocation16_spill] sm:$0xff] %v3896_v32  ;;  %v3899_v45 = vadd.f32 %v1788_v55, %v1636_v5  ;;  %v1638_v8 = vadd.f32 %v1637_v23, %v3782_v37  ;;  %v1790_v58 = vpop.f32.mrf.mxu1 }
 0x186   :  { %v1641_v26 = vpop.f32.mrf.mxu0 }
 0x187   :  { %4135 = vst [vmem:[#allocation17_spill] sm:$0xff] %v3899_v45  ;;  %v3902_v62 = vadd.f32 %v1790_v58, %v1638_v8  ;;  %v1642_v11 = vadd.f32 %v1641_v26, %v3785_v40  ;;  %v1794_v61 = vpop.f32.mrf.mxu1 }
 0x188   :  { %v1643_v29 = vpop.f32.mrf.mxu0 }
 0x189   :  { %4136 = vst [vmem:[#allocation18_spill] sm:$0xff] %v3902_v62  ;;  %v3905_v47 = vadd.f32 %v1794_v61, %v1642_v11  ;;  %v1644_v15 = vadd.f32 %v1643_v29, %v3788_v43  ;;  %v1796_v0 = vpop.f32.mrf.mxu1 }
 0x18a   :  { %v1645_v34 = vpop.f32.mrf.mxu0 }
 0x18b   :  { %4137 = vst [vmem:[#allocation19_spill] sm:$0xff] %v3905_v47  ;;  %v3908_v50 = vadd.f32 %v1796_v0, %v1644_v15  ;;  %v1646_v20 = vadd.f32 %v1645_v34, %v3796_v49  ;;  %v1798_v5 = vpop.f32.mrf.mxu1 }
 0x18c   :  { %v1647_v37 = vpop.f32.mrf.mxu0 }
 0x18d   :  { %4138 = vst [vmem:[#allocation20_spill] sm:$0xff] %v3908_v50  ;;  %v3911_v55 = vadd.f32 %v1798_v5, %v1646_v20  ;;  %v1648_v23 = vadd.f32 %v1647_v37, %v3798_v53  ;;  %v1800_v8 = vpop.f32.mrf.mxu1 }
 0x18e   :  { %v1651_v40 = vpop.f32.mrf.mxu0 }
 0x18f   :  { %4139 = vst [vmem:[#allocation21_spill] sm:$0xff] %v3911_v55  ;;  %v3914_v58 = vadd.f32 %v1800_v8, %v1648_v23  ;;  %v1652_v26 = vadd.f32 %v1651_v40, %v3800_v56  ;;  %v1804_v11 = vpop.f32.mrf.mxu1 }
 0x190   :  { %v1653_v43 = vpop.f32.mrf.mxu0 }
 0x191   :  { %4140 = vst [vmem:[#allocation22_spill] sm:$0xff] %v3914_v58  ;;  %v3917_v61 = vadd.f32 %v1804_v11, %v1652_v26  ;;  %v1654_v29 = vadd.f32 %v1653_v43, %v3802_v60  ;;  %v1806_v15 = vpop.f32.mrf.mxu1 }
 0x192   :  { %v1655_v49 = vpop.f32.mrf.mxu0 }
 0x193   :  { %4141 = vst [vmem:[#allocation23_spill] sm:$0xff] %v3917_v61  ;;  %v3920_v0 = vadd.f32 %v1806_v15, %v1654_v29  ;;  %v1656_v34 = vadd.f32 %v1655_v49, %v3804_v1  ;;  %v1808_v20 = vpop.f32.mrf.mxu1 }
 0x194   :  { %v1657_v53 = vpop.f32.mrf.mxu0 }
 0x195   :  { %4142 = vst [vmem:[#allocation24_spill] sm:$0xff] %v3920_v0  ;;  %v3923_v5 = vadd.f32 %v1808_v20, %v1656_v34  ;;  %v1658_v37 = vadd.f32 %v1657_v53, %v3806_v4  ;;  %v1810_v23 = vpop.f32.mrf.mxu1 }
 0x196   :  { %v1661_v56 = vpop.f32.mrf.mxu0 }
 0x197   :  { %4143 = vst [vmem:[#allocation25_spill] sm:$0xff] %v3923_v5  ;;  %v3926_v8 = vadd.f32 %v1810_v23, %v1658_v37  ;;  %v1814_v40 = vpop.f32.mrf.mxu1 }
 0x198   :  { %v1663_v26 = vpop.f32.mrf.mxu0 }
 0x199   :  { %4144 = vst [vmem:[#allocation26_spill] sm:$0xff] %v3926_v8  ;;  %v1816_v11 = vpop.f32.mrf.mxu1 }
 0x19a   :  { %v1665_v60 = vpop.f32.mrf.mxu0 }
 0x19b   :  { %v1818_v43 = vpop.f32.mrf.mxu1 }
 0x19c   :  { %v1667_v19 = vpop.f32.mrf.mxu0 }
 0x19d   :  { %v3928_v29 = vpop.f32.mrf.mxu1 }
 0x19e   :  { %v1671_v15 = vpop.f32.mrf.mxu0 }
 0x19f   :  { %v3930_v1 = vpop.f32.mrf.mxu1 }
 0x1a0   :  { %v1673_v49 = vpop.f32.mrf.mxu0 }
 0x1a1   :  { %v3932_v34 = vpop.f32.mrf.mxu1 }
 0x1a2   :  { %v3934_v20 = vpop.f32.mrf.mxu0 }
 0x1a3   :  { %v3936_v4 = vpop.f32.mrf.mxu1 }
 0x1a4   :  { %v3938_v53 = vpop.f32.mrf.mxu0 }
 0x1a5   :  { %v3940_v37 = vpop.f32.mrf.mxu1 }
 0x1a6   :  { %v3942_v23 = vpop.f32.mrf.mxu0 }
 0x1a7   :  { %v3944_v8 = vpop.f32.mrf.mxu1 }
 0x1a8   :  { %v3946_v5 = vpop.f32.mrf.mxu0 }
 0x1a9   :  { %v3948_v0 = vpop.f32.mrf.mxu1 }
 0x1aa   :  { %v3950_v61 = vpop.f32.mrf.mxu0 }
 0x1ab   :  { %v3952_v10 = vpop.f32.mrf.mxu1 }
 0x1ac   :  { %v3954_v58 = vpop.f32.mrf.mxu0 }
 0x1ad   :  { %v3956_v63 = vpop.f32.mrf.mxu1 }
 0x1ae   :  { %v3958_v55 = vpop.f32.mrf.mxu0 }
 0x1af   :  { %v3960_v54 = vpop.f32.mrf.mxu1 }
 0x1b0   :  { %4145 = vst [vmem:[#allocation27_spill] sm:$0xff] %v3960_v54  ;;  %v3962_v50 = vpop.f32.mrf.mxu0 }
 0x1b1   :  { %v3964_v46 = vpop.f32.mrf.mxu1 }
 0x1b2   :  { %4146 = vst [vmem:[#allocation28_spill] sm:$0xff] %v3964_v46  ;;  %v3966_v47 = vpop.f32.mrf.mxu0 }
 0x1b3   :  { %4147 = vst [vmem:[#allocation29_spill] sm:$0xff] %v3966_v47  ;;  %v3968_v41 = vpop.f32.mrf.mxu1 }
 0x1b4   :  { %4148 = vst [vmem:[#allocation30_spill] sm:$0xff] %v3968_v41  ;;  %v3970_v62 = vpop.f32.mrf.mxu0 }
 0x1b5   :  { %4149 = vst [vmem:[#allocation31_spill] sm:$0xff] %v3970_v62  ;;  %v3972_v33 = vpop.f32.mrf.mxu1 }
 0x1b6   :  { %4150 = vst [vmem:[#allocation32_spill] sm:$0xff] %v3972_v33  ;;  %v3974_v45 = vpop.f32.mrf.mxu0 }
 0x1b7   :  { %4151 = vst [vmem:[#allocation33_spill] sm:$0xff] %v3974_v45  ;;  %v3976_v28 = vpop.f32.mrf.mxu1 }
 0x1b8   :  { %4152 = vst [vmem:[#allocation34_spill] sm:$0xff] %v3976_v28  ;;  %v3978_v32 = vpop.f32.mrf.mxu0  ;;  %v1662_v28 = vadd.f32 %v1661_v56, %v3808_v9  ;;  %v1668_v9 = vadd.f32 %v1667_v19, %v3814_v22 }
 0x1b9   :  { %4153 = vst [vmem:[#allocation35_spill] sm:$0xff] %v3978_v32  ;;  %v3980_v21 = vpop.f32.mrf.mxu1 }
 0x1ba   :  { %4154 = vst [vmem:[#allocation36_spill] sm:$0xff] %v3980_v21  ;;  %v3982_v24 = vpop.f32.mrf.mxu0  ;;  %v1821_v22 = vadd.f32 %v3928_v29, %v1668_v9 }
 0x1bb   :  { %4155 = vst [vmem:[#allocation37_spill] sm:$0xff] %v3982_v24  ;;  %v3984_v16 = vpop.f32.mrf.mxu1 }
 0x1bc   :  { %4156 = vst [vmem:[#allocation38_spill] sm:$0xff] %v3984_v16  ;;  %v3986_v46 = vpop.f32.mrf.mxu0  ;;  %v1664_v16 = vadd.f32 %v1663_v26, %v3810_v14 }
 0x1bd   :  { %4157 = vst [vmem:[#allocation39_spill] sm:$0xff] %v3986_v46  ;;  %v3988_v47 = vpop.f32.mrf.mxu1 }
 0x1be   :  { %4158 = vst [vmem:[#allocation40_spill] sm:$0xff] %v3988_v47  ;;  %v3990_v41 = vpop.f32.mrf.mxu0  ;;  %v1815_v47 = vadd.f32 %v1814_v40, %v1662_v28 }
 0x1bf   :  { %4159 = vst [vmem:[#allocation41_spill] sm:$0xff] %v3990_v41  ;;  %v3992_v62 = vpop.f32.mrf.mxu1  ;;  %v1666_v41 = vadd.f32 %v1665_v60, %v3812_v18  ;;  %v1682_v60 = vadd.f32 %v3942_v23, %v3824_v44  ;;  %v1688_v23 = vadd.f32 %v3954_v58, %v3830_v59 }
 0x1c0   :  { %4160 = vst [vmem:[#allocation42_spill] sm:$0xff] %v3992_v62  ;;  %v3994_v33 = vpop.f32.mrf.mxu0 }
 0x1c1   :  { %4161 = vst [vmem:[#allocation43_spill] sm:$0xff] %v3994_v33  ;;  %v3996_v45 = vpop.f32.mrf.mxu1 }
 0x1c2   :  { %4162 = vst [vmem:[#allocation44_spill] sm:$0xff] %v3996_v45  ;;  %v3999_v32 = vpop.f32.mrf.mxu0  ;;  %v1817_v45 = vadd.f32 %v1816_v11, %v1664_v16 }
 0x1c3   :  { %4163 = vst [vmem:[#allocation45_spill] sm:$0xff] %v3999_v32  ;;  %v4001_v21 = vpop.f32.mrf.mxu1 }
 0x1c4   :  { %4164 = vst [vmem:[#allocation46_spill] sm:$0xff] %v4001_v21  ;;  %v4004_v24 = vpop.f32.mrf.mxu0  ;;  %v1819_v21 = vadd.f32 %v1818_v43, %v1666_v41 }
 0x1c5   :  { %v4006_v46 = vpop.f32.mrf.mxu1 }
 0x1c6   :  { %4165 = vst [vmem:[#allocation47_spill] sm:$0xff] %v4006_v46  ;;  %v1907_v62 = vpop.f32.mrf.mxu0  ;;  %v1672_v46 = vadd.f32 %v1671_v15, %v3816_v27 }
 0x1c7   :  { %v1908_v33 = vadd.f32 %v1907_v62, %v3857_v36  ;;  %v1967_v54 = vpop.f32.mrf.mxu1 }
 0x1c8   :  { %v1968_v56 = vadd.f32 %v1967_v54, %v1815_v47  ;;  %v1909_v32 = vpop.f32.mrf.mxu0  ;;  %v1674_v54 = vadd.f32 %v1673_v49, %v3818_v31  ;;  %v1678_v47 = vadd.f32 %v3938_v53, %v3822_v39 }
 0x1c9   :  { %2026 = vst [vmem:[#allocation2] sm:$0xff] %v1908_v33  ;;  %v1910_v14 = vadd.f32 %v1909_v32, %v3860_v51  ;;  %v1969_v26 = vpop.f32.mrf.mxu1  ;;  %v1825_v51 = vadd.f32 %v3930_v1, %v1672_v46  ;;  %v1676_v32 = vadd.f32 %v3934_v20, %v3820_v35  ;;  %v1684_v1 = vadd.f32 %v3946_v5, %v3826_v48 }
 0x1ca   :  { %2051 = vst [vmem:[#allocation2 + $0xc0] sm:$0xff] %v1968_v56  ;;  %v1970_v28 = vadd.f32 %v1969_v26, %v1817_v45  ;;  %v1911_v18 = vpop.f32.mrf.mxu0  ;;  %v1831_v15 = vadd.f32 %v3940_v37, %v1678_v47  ;;  %v1835_v20 = vadd.f32 %v3944_v8, %v1682_v60  ;;  %v1692_v56 = vadd.f32 %v3958_v55, %v3832_v2  ;;  %v4175_v47 = vld [vmem:[#allocation7_spill] sm:$0xff] }
 0x1cb   :  { %2028 = vst.msk [vmem:[#allocation2 + $0x8] sm:$0xff] %vm2027_vm0, %v1910_v14  ;;  %v1912_v36 = vadd.f32 %v1911_v18, %v3863_v3  ;;  %v1971_v16 = vpop.f32.mrf.mxu1  ;;  %v1829_v11 = vadd.f32 %v3936_v4, %v1676_v32  ;;  %v1686_v4 = vadd.f32 %v3950_v61, %v3828_v12  ;;  %v1837_v37 = vadd.f32 %v3948_v0, %v1684_v1 }
 0x1cc   :  { %2052 = vst.msk [vmem:[#allocation2 + $0xc8] sm:$0xff] %vm2027_vm0, %v1970_v28  ;;  %v1972_v33 = vadd.f32 %v1971_v16, %v1819_v21  ;;  %v1913_v19 = vpop.f32.mrf.mxu0  ;;  %v1827_v21 = vadd.f32 %v3932_v34, %v1674_v54  ;;  %v1841_v0 = vadd.f32 %v3956_v63, %v1688_v23  ;;  %v1694_v26 = vadd.f32 %v3962_v50, %v3834_v7  ;;  %v4166_v28 = vld [vmem:[#allocation27_spill] sm:$0xff]  ;;  %v4168_v16 = vld [vmem:[#allocation29_spill] sm:$0xff] }
 0x1cd   :  { %2029 = vst [vmem:[#allocation2 + $0x10] sm:$0xff] %v1912_v36  ;;  %v1914_v41 = vadd.f32 %v1913_v19, %v3866_v17  ;;  %v1973_v27 = vpop.f32.mrf.mxu1  ;;  %v1839_v9 = vadd.f32 %v3952_v10, %v1686_v4  ;;  %v1845_v18 = vadd.f32 %v4166_v28, %v1692_v56  ;;  %v4167_v36 = vld [vmem:[#allocation5_spill] sm:$0xff]  ;;  %v4169_v63 = vld [vmem:[#allocation15_spill] sm:$0xff]  ;;  %v4182_v4 = vld [vmem:[#allocation34_spill] sm:$0xff] }
 0x1ce   :  { %2053 = vst [vmem:[#allocation2 + $0xd0] sm:$0xff] %v1972_v33  ;;  %v1974_v3 = vadd.f32 %v1973_v27, %v1821_v22  ;;  %v1917_v45 = vpop.f32.mrf.mxu0  ;;  %v1696_v22 = vadd.f32 %v4168_v16, %v4167_v36  ;;  %v4170_v33 = vld [vmem:[#allocation28_spill] sm:$0xff]  ;;  %v4172_v27 = vld [vmem:[#allocation31_spill] sm:$0xff]  ;;  %v4187_v56 = vld [vmem:[#allocation10_spill] sm:$0xff] }
 0x1cf   :  { %2030 = vst.msk [vmem:[#allocation2 + $0x18] sm:$0xff] %vm2027_vm0, %v1914_v41  ;;  %v1918_v31 = vadd.f32 %v1917_v45, %v3869_v30  ;;  %v1977_v62 = vpop.f32.mrf.mxu1  ;;  %v1847_v19 = vadd.f32 %v4170_v33, %v1694_v26  ;;  %v4171_v41 = vld [vmem:[#allocation6_spill] sm:$0xff]  ;;  %v4192_v28 = vld [vmem:[#allocation41_spill] sm:$0xff]  ;;  %v4196_v33 = vld [vmem:[#allocation43_spill] sm:$0xff] }
 0x1d0   :  { %2054 = vst.msk [vmem:[#allocation2 + $0xd8] sm:$0xff] %vm2027_vm0, %v1974_v3  ;;  %v1978_v17 = vadd.f32 %v1977_v62, %v1825_v51  ;;  %v1919_v46 = vpop.f32.mrf.mxu0  ;;  %v1698_v51 = vadd.f32 %v4172_v27, %v4171_v41  ;;  %v4173_v3 = vld [vmem:[#allocation16_spill] sm:$0xff]  ;;  %v4174_v62 = vld [vmem:[#allocation30_spill] sm:$0xff] }
 0x1d1   :  { %2031 = vst [vmem:[#allocation2 + $0x20] sm:$0xff] %v1918_v31  ;;  %v1920_v35 = vadd.f32 %v1919_v46, %v3872_v42  ;;  %v1979_v40 = vpop.f32.mrf.mxu1 }
 0x1d2   :  { %2055 = vst [vmem:[#allocation2 + $0xe0] sm:$0xff] %v1978_v17  ;;  %v1980_v30 = vadd.f32 %v1979_v40, %v1827_v21  ;;  %v1921_v43 = vpop.f32.mrf.mxu0  ;;  %v1849_v21 = vadd.f32 %v4174_v62, %v1696_v22  ;;  %v4176_v17 = vld [vmem:[#allocation33_spill] sm:$0xff] }
 0x1d3   :  { %2032 = vst.msk [vmem:[#allocation2 + $0x28] sm:$0xff] %vm2027_vm0, %v1920_v35  ;;  %v1922_v39 = vadd.f32 %v1921_v43, %v3875_v57  ;;  %v1981_v29 = vpop.f32.mrf.mxu1  ;;  %v1702_v46 = vadd.f32 %v4176_v17, %v4175_v47  ;;  %v4178_v43 = vld [vmem:[#allocation32_spill] sm:$0xff]  ;;  %v4193_v22 = vld [vmem:[#allocation21_spill] sm:$0xff] }
 0x1d4   :  { %2056 = vst.msk [vmem:[#allocation2 + $0xe8] sm:$0xff] %vm2027_vm0, %v1980_v30  ;;  %v1982_v42 = vadd.f32 %v1981_v29, %v1829_v11  ;;  %v1923_v49 = vpop.f32.mrf.mxu0  ;;  %v4177_v11 = vld [vmem:[#allocation17_spill] sm:$0xff]  ;;  %v4179_v29 = vld [vmem:[#allocation8_spill] sm:$0xff] }
 0x1d5   :  { %2033 = vst [vmem:[#allocation2 + $0x30] sm:$0xff] %v1922_v39  ;;  %v1924_v44 = vadd.f32 %v1923_v49, %v3878_v13  ;;  %v1983_v34 = vpop.f32.mrf.mxu1  ;;  %v1851_v39 = vadd.f32 %v4178_v43, %v1698_v51  ;;  %v4197_v51 = vld [vmem:[#allocation22_spill] sm:$0xff]  ;;  %v4200_v62 = vld [vmem:[#allocation45_spill] sm:$0xff] }
 0x1d6   :  { %2057 = vst [vmem:[#allocation2 + $0xf0] sm:$0xff] %v1982_v42  ;;  %v1984_v57 = vadd.f32 %v1983_v34, %v1831_v15  ;;  %v1927_v53 = vpop.f32.mrf.mxu0  ;;  %v4180_v15 = vld [vmem:[#allocation35_spill] sm:$0xff] }
 0x1d7   :  { %2034 = vst.msk [vmem:[#allocation2 + $0x38] sm:$0xff] %vm2027_vm0, %v1924_v44  ;;  %v1928_v48 = vadd.f32 %v1927_v53, %v3881_v25  ;;  %v1987_v5 = vpop.f32.mrf.mxu1  ;;  %v1704_v1 = vadd.f32 %v4180_v15, %v4179_v29  ;;  %v4181_v44 = vld [vmem:[#allocation18_spill] sm:$0xff]  ;;  %v4183_v53 = vld [vmem:[#allocation9_spill] sm:$0xff]  ;;  %v4204_v15 = vld [vmem:[#allocation24_spill] sm:$0xff] }
 0x1d8   :  { %2058 = vst.msk [vmem:[#allocation2 + $0xf8] sm:$0xff] %vm2027_vm0, %v1984_v57  ;;  %v1988_v13 = vadd.f32 %v1987_v5, %v1835_v20  ;;  %v1929_v8 = vpop.f32.mrf.mxu0  ;;  %v1855_v57 = vadd.f32 %v4182_v4, %v1702_v46  ;;  %v4201_v46 = vld [vmem:[#allocation23_spill] sm:$0xff]  ;;  %v4206_v4 = vld [vmem:[#allocation25_spill] sm:$0xff] }
 0x1d9   :  { %2035 = vst [vmem:[#allocation2 + $0x40] sm:$0xff] %v1928_v48  ;;  %v1930_v12 = vadd.f32 %v1929_v8, %v3884_v38  ;;  %v1989_v61 = vpop.f32.mrf.mxu1  ;;  %v4184_v48 = vld [vmem:[#allocation37_spill] sm:$0xff] }
 0x1da   :  { %2059 = vst [vmem:[#allocation2 + $0x100] sm:$0xff] %v1988_v13  ;;  %v1990_v25 = vadd.f32 %v1989_v61, %v1837_v37  ;;  %v1931_v14 = vpop.f32.mrf.mxu0  ;;  %v1706_v5 = vadd.f32 %v4184_v48, %v4183_v53  ;;  %v4185_v13 = vld [vmem:[#allocation19_spill] sm:$0xff]  ;;  %v4186_v61 = vld [vmem:[#allocation36_spill] sm:$0xff] }
 0x1db   :  { %2036 = vst.msk [vmem:[#allocation2 + $0x48] sm:$0xff] %vm2027_vm0, %v1930_v12  ;;  %v1932_v59 = vadd.f32 %v1931_v14, %v3887_v52  ;;  %v1991_v58 = vpop.f32.mrf.mxu1  ;;  %v4207_v53 = vld [vmem:[#allocation47_spill] sm:$0xff] }
 0x1dc   :  { %2060 = vst.msk [vmem:[#allocation2 + $0x108] sm:$0xff] %vm2027_vm0, %v1990_v25  ;;  %v1992_v38 = vadd.f32 %v1991_v58, %v1839_v9  ;;  %v1933_v10 = vpop.f32.mrf.mxu0  ;;  %v1857_v9 = vadd.f32 %v4186_v61, %v1704_v1  ;;  %v4188_v25 = vld [vmem:[#allocation39_spill] sm:$0xff] }
 0x1dd   :  { %2037 = vst [vmem:[#allocation2 + $0x50] sm:$0xff] %v1932_v59  ;;  %v1934_v2 = vadd.f32 %v1933_v10, %v3890_v6  ;;  %v1993_v55 = vpop.f32.mrf.mxu1  ;;  %v1708_v14 = vadd.f32 %v4188_v25, %v4187_v56  ;;  %v4190_v10 = vld [vmem:[#allocation38_spill] sm:$0xff] }
 0x1de   :  { %2061 = vst [vmem:[#allocation2 + $0x110] sm:$0xff] %v1992_v38  ;;  %v1994_v52 = vadd.f32 %v1993_v55, %v1841_v0  ;;  %v1937_v54 = vpop.f32.mrf.mxu0  ;;  %v4189_v0 = vld [vmem:[#allocation20_spill] sm:$0xff]  ;;  %v4191_v55 = vld [vmem:[#allocation11_spill] sm:$0xff] }
 0x1df   :  { %2038 = vst.msk [vmem:[#allocation2 + $0x58] sm:$0xff] %vm2027_vm0, %v1934_v2  ;;  %v1938_v7 = vadd.f32 %v1937_v54, %v4169_v63  ;;  %v1997_v50 = vpop.f32.mrf.mxu1  ;;  %v1859_v2 = vadd.f32 %v4190_v10, %v1706_v5  ;;  %v4194_v63 = vld [vmem:[#allocation40_spill] sm:$0xff] }
 0x1e0   :  { %2062 = vst.msk [vmem:[#allocation2 + $0x118] sm:$0xff] %vm2027_vm0, %v1994_v52  ;;  %v1998_v6 = vadd.f32 %v1997_v50, %v1845_v18  ;;  %v1939_v32 = vpop.f32.mrf.mxu0  ;;  %v1712_v18 = vadd.f32 %v4192_v28, %v4191_v55  ;;  %v4195_v50 = vld [vmem:[#allocation12_spill] sm:$0xff] }
 0x1e1   :  { %2039 = vst [vmem:[#allocation2 + $0x60] sm:$0xff] %v1938_v7  ;;  %v1940_v45 = vadd.f32 %v1939_v32, %v4173_v3  ;;  %v1999_v31 = vpop.f32.mrf.mxu1  ;;  %v1861_v7 = vadd.f32 %v4194_v63, %v1708_v14  ;;  %v4198_v3 = vld [vmem:[#allocation42_spill] sm:$0xff] }
 0x1e2   :  { %2063 = vst [vmem:[#allocation2 + $0x120] sm:$0xff] %v1998_v6  ;;  %v2000_v35 = vadd.f32 %v1999_v31, %v1847_v19  ;;  %v1941_v40 = vpop.f32.mrf.mxu0  ;;  %v1714_v19 = vadd.f32 %v4196_v33, %v4195_v50  ;;  %v4199_v31 = vld [vmem:[#allocation13_spill] sm:$0xff] }
 0x1e3   :  { %2040 = vst.msk [vmem:[#allocation2 + $0x68] sm:$0xff] %vm2027_vm0, %v1940_v45  ;;  %v1942_v60 = vadd.f32 %v1941_v40, %v4177_v11  ;;  %v2001_v30 = vpop.f32.mrf.mxu1  ;;  %v1865_v45 = vadd.f32 %v4198_v3, %v1712_v18  ;;  %v4202_v11 = vld [vmem:[#allocation44_spill] sm:$0xff] }
 0x1e4   :  { %2064 = vst.msk [vmem:[#allocation2 + $0x128] sm:$0xff] %vm2027_vm0, %v2000_v35  ;;  %v2002_v42 = vadd.f32 %v2001_v30, %v1849_v21  ;;  %v1943_v49 = vpop.f32.mrf.mxu0  ;;  %v1716_v21 = vadd.f32 %v4200_v62, %v4199_v31  ;;  %v4203_v30 = vld [vmem:[#allocation14_spill] sm:$0xff] }
 0x1e5   :  { %2041 = vst [vmem:[#allocation2 + $0x70] sm:$0xff] %v1942_v60  ;;  %v1944_v34 = vadd.f32 %v1943_v49, %v4181_v44  ;;  %v2003_v20 = vpop.f32.mrf.mxu1  ;;  %v1867_v60 = vadd.f32 %v4202_v11, %v1714_v19  ;;  %v1718_v43 = vadd.f32 %v4004_v24, %v4203_v30  ;;  %v4205_v49 = vld [vmem:[#allocation46_spill] sm:$0xff] }
 0x1e6   :  { %2065 = vst [vmem:[#allocation2 + $0x130] sm:$0xff] %v2002_v42  ;;  %v2004_v37 = vadd.f32 %v2003_v20, %v1851_v39  ;;  %v1947_v23 = vpop.f32.mrf.mxu0  ;;  %v1869_v44 = vadd.f32 %v4205_v49, %v1716_v21 }
 0x1e7   :  { %2042 = vst.msk [vmem:[#allocation2 + $0x78] sm:$0xff] %vm2027_vm0, %v1944_v34  ;;  %v1948_v8 = vadd.f32 %v1947_v23, %v4185_v13  ;;  %v2007_v12 = vpop.f32.mrf.mxu1  ;;  %v1871_v48 = vadd.f32 %v4207_v53, %v1718_v43  ;;  %v4208_v23 = vld [vmem:[#allocation26_spill] sm:$0xff] }
 0x1e8   :  { %2066 = vst.msk [vmem:[#allocation2 + $0x138] sm:$0xff] %vm2027_vm0, %v2004_v37  ;;  %v2008_v59 = vadd.f32 %v2007_v12, %v1855_v57  ;;  %v1949_v58 = vpop.f32.mrf.mxu0 }
 0x1e9   :  { %2043 = vst [vmem:[#allocation2 + $0x80] sm:$0xff] %v1948_v8  ;;  %v1950_v26 = vadd.f32 %v1949_v58, %v4189_v0  ;;  %v2009_v38 = vpop.f32.mrf.mxu1 }
 0x1ea   :  { %2067 = vst [vmem:[#allocation2 + $0x140] sm:$0xff] %v2008_v59  ;;  %v2010_v36 = vadd.f32 %v2009_v38, %v1857_v9  ;;  %v1951_v16 = vpop.f32.mrf.mxu0 }
 0x1eb   :  { %2044 = vst.msk [vmem:[#allocation2 + $0x88] sm:$0xff] %vm2027_vm0, %v1950_v26  ;;  %v1952_v52 = vadd.f32 %v1951_v16, %v4193_v22  ;;  %v2011_v54 = vpop.f32.mrf.mxu1 }
 0x1ec   :  { %2068 = vst.msk [vmem:[#allocation2 + $0x148] sm:$0xff] %vm2027_vm0, %v2010_v36  ;;  %v2012_v41 = vadd.f32 %v2011_v54, %v1859_v2  ;;  %v1953_v27 = vpop.f32.mrf.mxu0 }
 0x1ed   :  { %2045 = vst [vmem:[#allocation2 + $0x90] sm:$0xff] %v1952_v52  ;;  %v1954_v6 = vadd.f32 %v1953_v27, %v4197_v51  ;;  %v2013_v32 = vpop.f32.mrf.mxu1 }
 0x1ee   :  { %2069 = vst [vmem:[#allocation2 + $0x150] sm:$0xff] %v2012_v41  ;;  %v2014_v47 = vadd.f32 %v2013_v32, %v1861_v7  ;;  %v1957_v17 = vpop.f32.mrf.mxu0 }
 0x1ef   :  { %2046 = vst.msk [vmem:[#allocation2 + $0x98] sm:$0xff] %vm2027_vm0, %v1954_v6  ;;  %v1958_v35 = vadd.f32 %v1957_v17, %v4201_v46  ;;  %v2017_v40 = vpop.f32.mrf.mxu1 }
 0x1f0   :  { %2070 = vst.msk [vmem:[#allocation2 + $0x158] sm:$0xff] %vm2027_vm0, %v2014_v47  ;;  %v2018_v39 = vadd.f32 %v2017_v40, %v1865_v45  ;;  %v1959_v29 = vpop.f32.mrf.mxu0 }
 0x1f1   :  { %2047 = vst [vmem:[#allocation2 + $0xa0] sm:$0xff] %v1958_v35  ;;  %v1960_v1 = vadd.f32 %v1959_v29, %v4204_v15  ;;  %v2019_v42 = vpop.f32.mrf.mxu1 }
 0x1f2   :  { %2071 = vst [vmem:[#allocation2 + $0x160] sm:$0xff] %v2018_v39  ;;  %v2020_v34 = vadd.f32 %v2019_v42, %v1867_v60  ;;  %v1961_v20 = vpop.f32.mrf.mxu0 }
 0x1f3   :  { %2048 = vst.msk [vmem:[#allocation2 + $0xa8] sm:$0xff] %vm2027_vm0, %v1960_v1  ;;  %v1962_v57 = vadd.f32 %v1961_v20, %v4206_v4  ;;  %v2021_v24 = vpop.f32.mrf.mxu1 }
 0x1f4   :  { %2072 = vst.msk [vmem:[#allocation2 + $0x168] sm:$0xff] %vm2027_vm0, %v2020_v34  ;;  %v2022_v5 = vadd.f32 %v2021_v24, %v1869_v44  ;;  %v1963_v37 = vpop.f32.mrf.mxu0 }
 0x1f5   :  { %2049 = vst [vmem:[#allocation2 + $0xb0] sm:$0xff] %v1962_v57  ;;  %v1964_v13 = vadd.f32 %v1963_v37, %v4208_v23  ;;  %v2023_v8 = vpop.f32.mrf.mxu1 }
 0x1f6   :  { %2073 = vst [vmem:[#allocation2 + $0x170] sm:$0xff] %v2022_v5  ;;  %v2024_v12 = vadd.f32 %v2023_v8, %v1871_v48 }
 0x1f7   :  { %2050 = vst.msk [vmem:[#allocation2 + $0xb8] sm:$0xff] %vm2027_vm0, %v1964_v13 }
 0x1f8   :  { %2074 = vst.msk [vmem:[#allocation2 + $0x178] sm:$0xff] %vm2027_vm0, %v2024_v12 }
 0x1f9   :  { %2386 = shalt.err (!%p2383_p4)
}
 0x1fa   :  { %s2399_s16 = smov 256   ;;  %s2400_s0 = smov 16  }
 0x1fb   :  { %2086 = dma.vmem_to_hbm [thread:$0]  %s2081_s14, 6144, %s4122_s2, [#allocation3], %s2399_s16, %s2399_s16, %s2400_s0  }
 0x1fc   :  { %2395 = dma.done.wait [#allocation3], 6144  }
 0x1fd   :  { %2396 = vsyncadd [#allocation3], 4294961152 }
 0x1fe   :  { %2090 = vsyncpa [#allocation3], 1 }

</bundles_post_ra>
